<compile_context>
chip_gen: v5e
topology: v5e:2x2
jax: 0.10.0
libtpu: 0.0.40
codegen_flags: <defaults>
</compile_context>

<pallas_src>
import math

import jax
import jax.numpy as jnp
from jax.experimental import pallas as pl
from jax.experimental.pallas import tpu as pltpu

_GELU_C = math.sqrt(2.0 / math.pi)

# fvec row indices (packed [16, F] vector-parameter table)
_R_DIV, _R_PHASE, _R_WE_E, _R_BE = 0, 1, 2, 3
_R_LN1G, _R_LN1B, _R_LN2G, _R_LN2B = 4, 5, 6, 7
_R_BQ, _R_BK, _R_BV, _R_BO, _R_BF1, _R_BF2 = 8, 9, 10, 11, 12, 13
_R_WD, _R_BD = 14, 15
_NUM_FVEC = 16

# fw slab indices (packed [7, F, F] square weights, bf16)
_W_SC, _W_Q, _W_K, _W_V, _W_O, _W_F1, _W_F2 = 0, 1, 2, 3, 4, 5, 6


# ----------------------------- in-kernel helpers -----------------------------

def _mm(a, b):
    # a @ b with bf16 MXU inputs, f32 accumulation.
    return jnp.dot(a.astype(jnp.bfloat16), b.astype(jnp.bfloat16),
                   preferred_element_type=jnp.float32)


def _mm_t(a, b):
    # a @ b^T (contract last dims of both) with bf16 MXU inputs, f32 accumulation.
    return jax.lax.dot_general(a.astype(jnp.bfloat16), b.astype(jnp.bfloat16),
                               (((1,), (1,)), ((), ())),
                               preferred_element_type=jnp.float32)


def _gelu(x):
    # tanh-approx GELU (EUP tanh instead of a long VALU erf chain).
    return 0.5 * x * (1.0 + jnp.tanh(_GELU_C * (x + 0.044715 * x * x * x)))


def _layernorm(x, g, b, eps=1e-5):
    mu = jnp.mean(x, axis=-1, keepdims=True)
    xc = x - mu
    var = jnp.mean(xc * xc, axis=-1, keepdims=True)
    return xc * jax.lax.rsqrt(var + eps) * g + b


# ------------------------------- fused Pallas kernel -------------------------------

def _uniconv_kernel(e_ref, u_ref, x_ref, enc_ref, fvec_ref, fw_ref, mid_ref,
                    last_s_ref, cls_s_ref, last_y_ref, cls_y_ref, out_ref):
    f32 = jnp.float32
    e = e_ref[...]                                    # [N, 1] f32
    fvec = fvec_ref[...]                              # [16, F] f32 (this model's rows)

    def row(i):
        return fvec[i:i + 1]                          # [1, F] (broadcasts over rows)

    enc = enc_ref[...]                                # [nfeat+1, H]
    nfeat = enc.shape[0] - 1
    hidden = enc.shape[1]

    # ---- feat_encoder: Linear(nfeat -> hidden) ----
    h = _mm(x_ref[...], enc[0:nfeat, :]) + enc[nfeat:nfeat + 1, :]        # [N, H]

    # ---- Filter: SineEncoding + eig_w (cos folded in via +pi/2 phase rows) ----
    ang = e * row(_R_DIV) + row(_R_PHASE)                                 # [N, F]
    eig = e * row(_R_WE_E) + _mm(jnp.sin(ang), fw_ref[_W_SC]) + row(_R_BE)

    # ---- single-head self-attention (pre-LN, residual); 1/sqrt(F) folded into Wq/bq ----
    xn = _layernorm(eig, row(_R_LN1G), row(_R_LN1B))
    q = _mm(xn, fw_ref[_W_Q]) + row(_R_BQ)
    k = _mm(xn, fw_ref[_W_K]) + row(_R_BK)
    v = _mm(xn, fw_ref[_W_V]) + row(_R_BV)
    scores = _mm_t(q, k)                                                  # [N, N]
    scores = scores - jnp.max(scores, axis=-1, keepdims=True)
    p = jnp.exp(scores)
    attn = p * pl.reciprocal(jnp.sum(p, axis=-1, keepdims=True), approx=True)
    eig = eig + _mm(_mm(attn, v), fw_ref[_W_O]) + row(_R_BO)

    # ---- FFN (pre-LN, residual) ----
    y = _layernorm(eig, row(_R_LN2G), row(_R_LN2B))
    y = _gelu(_mm(y, fw_ref[_W_F1]) + row(_R_BF1))
    y = _mm(y, fw_ref[_W_F2]) + row(_R_BF2)
    eig = eig + y

    # ---- decoder -> per-eigenvalue filter; hoisted operator S = U diag(filt) U^T ----
    filt_row = _mm_t(row(_R_WD), eig) + fvec[_R_BD:_R_BD + 1, 0:1]        # [1, N]
    u_f = u_ref[...].astype(f32)                                          # [N, N]
    s_op = _mm_t(u_f * filt_row, u_f)                                     # [N, N]

    # ---- SpecLayer: (Dropout=identity) -> Linear -> LayerNorm -> GELU ----
    def spec_layer(hh, slab):
        w = slab[0:hidden, :]
        b = slab[hidden:hidden + 1, :]
        g = slab[hidden + 1:hidden + 2, :]
        bt = slab[hidden + 2:hidden + 3, :]
        return _gelu(_layernorm(_mm(hh, w) + b, g, bt))

    # hidden->hidden layers (same shape for both models; per-model slab via index_map)
    for l in range(mid_ref.shape[0]):
        h = h + _mm(s_op, h)                          # residual spectral propagation
        h = spec_layer(h, mid_ref[l])

    h = h + _mm(s_op, h)                              # propagation before the last layer

    # ---- last SpecLayer + classifier: signal_dim differs between models -> pl.when ----
    def finish(last_ref, cls_ref):
        hh = spec_layer(h, last_ref[...])
        cw = cls_ref[...]                             # [sig+1, 1]
        sig = cw.shape[0] - 1
        out_ref[...] = _mm(hh, cw[0:sig, :]) + cw[sig:sig + 1, :]

    @pl.when(pl.program_id(0) == 0)
    def _():
        finish(last_s_ref, cls_s_ref)

    @pl.when(pl.program_id(0) == 1)
    def _():
        finish(last_y_ref, cls_y_ref)


# ------------------------------- host wrapper -------------------------------

def uniconv_wrapper_forward(params_s, params_y, e, u, x):
    """Both models in ONE pallas_call, grid=(2,) parallel over models."""
    n = e.shape[0]
    e2 = e.reshape(n, 1).astype(jnp.float32)
    u_bf = u.astype(jnp.bfloat16)
    x32 = x.astype(jnp.float32)

    # stack shape-compatible params along a leading model axis
    enc2 = jnp.stack([params_s['enc'], params_y['enc']], axis=0)      # [2, nfeat+1, H]
    fvec2 = jnp.stack([params_s['fvec'], params_y['fvec']], axis=0)   # [2, 16, F]
    fw2 = jnp.stack([params_s['fw'], params_y['fw']], axis=0)         # [2, 7, F, F] bf16
    mid2 = jnp.stack([params_s['mid'], params_y['mid']], axis=0)      # [2, L-1, H+3, H]

    def const_spec(shape):
        nd = len(shape)
        return pl.BlockSpec(shape, lambda i: (0,) * nd)

    def model_spec(shape):
        nd = len(shape)
        return pl.BlockSpec((None,) + tuple(shape[1:]),
                            lambda i: (i,) + (0,) * (nd - 1))

    in_specs = [
        const_spec(e2.shape), const_spec(u_bf.shape), const_spec(x32.shape),
        model_spec(enc2.shape), model_spec(fvec2.shape),
        model_spec(fw2.shape), model_spec(mid2.shape),
        const_spec(params_s['last'].shape), const_spec(params_s['cls'].shape),
        const_spec(params_y['last'].shape), const_spec(params_y['cls'].shape),
    ]

    out = pl.pallas_call(
        _uniconv_kernel,
        out_shape=jax.ShapeDtypeStruct((2, n, 1), jnp.float32),
        grid=(2,),
        in_specs=in_specs,
        out_specs=pl.BlockSpec((None, n, 1), lambda i: (i, 0, 0)),
        compiler_params=pltpu.CompilerParams(
            dimension_semantics=("parallel",),
            vmem_limit_bytes=32 * 1024 * 1024),
    )(e2, u_bf, x32, enc2, fvec2, fw2, mid2,
      params_s['last'], params_s['cls'], params_y['last'], params_y['cls'])

    pred_s = out[0]
    pred_y = out[1]
    return pred_y, pred_s


# ------------------------------ parameter setup ------------------------------

def init_linear(key, din, dout):
    kw, kb = jax.random.split(key)
    s = 1.0 / math.sqrt(din)
    w = jax.random.uniform(kw, (din, dout), jnp.float32, -s, s)   # pre-transposed [din, dout]
    b = jax.random.uniform(kb, (1, dout), jnp.float32, -s, s)
    return w, b


def init_uniconv(key, nfeat, hidden_dim, signal_dim, filter_dim, nlayer):
    assert nlayer >= 2
    keys = jax.random.split(key, 9)
    p = {}

    enc_w, enc_b = init_linear(keys[0], nfeat, hidden_dim)
    p['enc'] = jnp.concatenate([enc_w, enc_b], axis=0)            # [nfeat+1, H]

    fdim = filter_dim
    wt_full, be = init_linear(keys[2], fdim + 1, fdim)            # eig_w: [e, sin, cos] -> F
    wqkv, bqkv = init_linear(keys[3], fdim, 3 * fdim)             # in_proj (q|k|v)
    wo, bo = init_linear(keys[4], fdim, fdim)
    wf1, bf1 = init_linear(keys[5], fdim, fdim)
    wf2, bf2 = init_linear(keys[6], fdim, fdim)
    wd, bd = init_linear(keys[7], fdim, 1)                        # decoder

    scale = 1.0 / math.sqrt(fdim)                                 # folded into Wq / bq

    div = jnp.exp(jnp.arange(0, fdim, 2, dtype=jnp.float32) * (-math.log(10000.0) / fdim))
    div100 = jnp.concatenate([div, div]) * 100.0
    phase = jnp.concatenate([jnp.zeros(fdim // 2, jnp.float32),
                             jnp.full((fdim // 2,), math.pi / 2.0, jnp.float32)])
    ones = jnp.ones((fdim,), jnp.float32)
    zeros = jnp.zeros((fdim,), jnp.float32)
    bd_row = zeros.at[0].set(bd[0, 0])

    p['fvec'] = jnp.stack([
        div100, phase,
        wt_full[0], be[0],
        ones, zeros,                                  # ln1 gamma/beta
        ones, zeros,                                  # ln2 gamma/beta
        bqkv[0, 0:fdim] * scale,
        bqkv[0, fdim:2 * fdim], bqkv[0, 2 * fdim:3 * fdim],
        bo[0], bf1[0], bf2[0],
        wd[:, 0], bd_row,
    ], axis=0)                                        # [16, F]
    assert p['fvec'].shape == (_NUM_FVEC, fdim)

    p['fw'] = jnp.stack([
        wt_full[1:],
        wqkv[:, 0:fdim] * scale,
        wqkv[:, fdim:2 * fdim], wqkv[:, 2 * fdim:3 * fdim],
        wo, wf1, wf2,
    ], axis=0).astype(jnp.bfloat16)                   # [7, F, F]

    # SpecLayer slabs: [W ; bias ; gamma ; beta] -> [H+3, dout]
    lkeys = jax.random.split(keys[8], nlayer)
    mids = []
    for lk in lkeys[:-1]:
        w, b = init_linear(lk, hidden_dim, hidden_dim)
        mids.append(jnp.concatenate([w, b,
                                     jnp.ones((1, hidden_dim), jnp.float32),
                                     jnp.zeros((1, hidden_dim), jnp.float32)], axis=0))
    p['mid'] = jnp.stack(mids, axis=0)                # [nlayer-1, H+3, H]

    w, b = init_linear(lkeys[-1], hidden_dim, signal_dim)
    p['last'] = jnp.concatenate([w, b,
                                 jnp.ones((1, signal_dim), jnp.float32),
                                 jnp.zeros((1, signal_dim), jnp.float32)], axis=0)  # [H+3, sig]

    cls_w, cls_b = init_linear(keys[1], signal_dim, 1)
    p['cls'] = jnp.concatenate([cls_w, cls_b], axis=0)            # [sig+1, 1]
    return p


# ------------------------------------ main ------------------------------------

if __name__ == "__main__":
    N, NFEAT = 16, 8
    HIDDEN, SIGNAL, FDIM, NLAYER = 32, 16, 32, 2

    key = jax.random.PRNGKey(0)
    k_e, k_u, k_x, k_s, k_y = jax.random.split(key, 5)
    e = jax.random.uniform(k_e, (N,), jnp.float32, 0.0, 2.0)          # eigenvalues
    u = jax.random.normal(k_u, (N, N), jnp.float32) / math.sqrt(N)    # eigenvectors
    x = jax.random.normal(k_x, (N, NFEAT), jnp.float32)               # node features

    params_s = init_uniconv(k_s, NFEAT, HIDDEN, SIGNAL, FDIM, NLAYER)
    # UniConvWrapper mutates config: signal_dim = hidden_dim for the second model.
    params_y = init_uniconv(k_y, NFEAT, HIDDEN, HIDDEN, FDIM, NLAYER)

    fwd = jax.jit(uniconv_wrapper_forward)
    pred_y, pred_s = fwd(params_s, params_y, e, u, x)
    jax.block_until_ready((pred_y, pred_s))

    assert pred_y.shape == (N, 1) and pred_s.shape == (N, 1)
    assert bool(jnp.all(jnp.isfinite(pred_y))) and bool(jnp.all(jnp.isfinite(pred_s)))
    print("KERNEL_OK")
</pallas_src>

<mosaic_0001>
module attributes {stable_mosaic.version = 11 : i64} {
  func.func @_uniconv_kernel(%arg0: i32, %arg1: memref<16x1xf32, #tpu.memory_space<vmem>>, %arg2: memref<16x16xbf16, #tpu.memory_space<vmem>>, %arg3: memref<16x8xf32, #tpu.memory_space<vmem>>, %arg4: memref<1x9x32xf32, #tpu.memory_space<vmem>>, %arg5: memref<1x16x32xf32, #tpu.memory_space<vmem>>, %arg6: memref<1x7x32x32xbf16, #tpu.memory_space<vmem>>, %arg7: memref<1x1x35x32xf32, #tpu.memory_space<vmem>>, %arg8: memref<35x16xf32, #tpu.memory_space<vmem>>, %arg9: memref<17x1xf32, #tpu.memory_space<vmem>>, %arg10: memref<35x32xf32, #tpu.memory_space<vmem>>, %arg11: memref<33x1xf32, #tpu.memory_space<vmem>>, %arg12: memref<1x16x1xf32, #tpu.memory_space<vmem>>) attributes {dimension_semantics = [#tpu.dimension_semantics<parallel>], iteration_bounds = array<i64: 2>, scalar_prefetch = 0 : i64, scratch_operands = 0 : i64, tpu.core_type = #tpu.core_type<tc>, window_params = [{pipeline_mode = #tpu.pipeline_mode<synchronous>, transform_indices = @transform_0, window_bounds = array<i64: 16, 1>}, {pipeline_mode = #tpu.pipeline_mode<synchronous>, transform_indices = @transform_1, window_bounds = array<i64: 16, 16>}, {pipeline_mode = #tpu.pipeline_mode<synchronous>, transform_indices = @transform_2, window_bounds = array<i64: 16, 8>}, {transform_indices = @transform_3, window_bounds = array<i64: 1, 9, 32>}, {transform_indices = @transform_4, window_bounds = array<i64: 1, 16, 32>}, {transform_indices = @transform_5, window_bounds = array<i64: 1, 7, 32, 32>}, {transform_indices = @transform_6, window_bounds = array<i64: 1, 1, 35, 32>}, {pipeline_mode = #tpu.pipeline_mode<synchronous>, transform_indices = @transform_7, window_bounds = array<i64: 35, 16>}, {pipeline_mode = #tpu.pipeline_mode<synchronous>, transform_indices = @transform_8, window_bounds = array<i64: 17, 1>}, {pipeline_mode = #tpu.pipeline_mode<synchronous>, transform_indices = @transform_9, window_bounds = array<i64: 35, 32>}, {pipeline_mode = #tpu.pipeline_mode<synchronous>, transform_indices = @transform_10, window_bounds = array<i64: 33, 1>}, {transform_indices = @transform_11, window_bounds = array<i64: 1, 16, 1>}]} {
    %c0 = arith.constant 0 : index
    %c0_0 = arith.constant 0 : index
    %0 = vector.load %arg1[%c0, %c0_0] : memref<16x1xf32, #tpu.memory_space<vmem>>, vector<16x1xf32>
    %c0_1 = arith.constant 0 : index
    %c0_2 = arith.constant 0 : index
    %c0_3 = arith.constant 0 : index
    %1 = vector.load %arg5[%c0_1, %c0_2, %c0_3] : memref<1x16x32xf32, #tpu.memory_space<vmem>>, vector<1x16x32xf32>
    %2 = vector.shape_cast %1 : vector<1x16x32xf32> to vector<16x32xf32>
    %c0_4 = arith.constant 0 : index
    %c0_5 = arith.constant 0 : index
    %c0_6 = arith.constant 0 : index
    %3 = vector.load %arg4[%c0_4, %c0_5, %c0_6] : memref<1x9x32xf32, #tpu.memory_space<vmem>>, vector<1x9x32xf32>
    %4 = vector.shape_cast %3 : vector<1x9x32xf32> to vector<9x32xf32>
    %c0_7 = arith.constant 0 : index
    %c0_8 = arith.constant 0 : index
    %5 = vector.load %arg3[%c0_7, %c0_8] : memref<16x8xf32, #tpu.memory_space<vmem>>, vector<16x8xf32>
    %6 = vector.extract_strided_slice %4 {offsets = [0, 0], sizes = [8, 32], strides = [1, 1]} : vector<9x32xf32> to vector<8x32xf32>
    %7 = arith.truncf %5 : vector<16x8xf32> to vector<16x8xbf16>
    %8 = arith.truncf %6 : vector<8x32xf32> to vector<8x32xbf16>
    %cst = arith.constant dense<0.000000e+00> : vector<16x32xf32>
    %9 = tpu.matmul %7, %8, %cst {dimension_numbers = #tpu.dot_dimension_numbers<[1], [0], [0], [1], [0, 0, 1, 1], [], []>} : vector<16x8xbf16>, vector<8x32xbf16>, vector<16x32xf32> -> vector<16x32xf32>
    %10 = vector.extract_strided_slice %4 {offsets = [8, 0], sizes = [1, 32], strides = [1, 1]} : vector<9x32xf32> to vector<1x32xf32>
    %11 = vector.broadcast %10 : vector<1x32xf32> to vector<16x32xf32>
    %12 = arith.addf %9, %11 : vector<16x32xf32>
    %13 = vector.extract_strided_slice %2 {offsets = [0, 0], sizes = [1, 32], strides = [1, 1]} : vector<16x32xf32> to vector<1x32xf32>
    %14 = vector.broadcast %0 : vector<16x1xf32> to vector<16x32xf32>
    %15 = vector.broadcast %13 : vector<1x32xf32> to vector<16x32xf32>
    %16 = arith.mulf %14, %15 : vector<16x32xf32>
    %17 = vector.extract_strided_slice %2 {offsets = [1, 0], sizes = [1, 32], strides = [1, 1]} : vector<16x32xf32> to vector<1x32xf32>
    %18 = vector.broadcast %17 : vector<1x32xf32> to vector<16x32xf32>
    %19 = arith.addf %16, %18 : vector<16x32xf32>
    %20 = vector.extract_strided_slice %2 {offsets = [2, 0], sizes = [1, 32], strides = [1, 1]} : vector<16x32xf32> to vector<1x32xf32>
    %21 = vector.broadcast %0 : vector<16x1xf32> to vector<16x32xf32>
    %22 = vector.broadcast %20 : vector<1x32xf32> to vector<16x32xf32>
    %23 = arith.mulf %21, %22 : vector<16x32xf32>
    %24 = math.sin %19 : vector<16x32xf32>
    %c0_9 = arith.constant 0 : index
    %c0_10 = arith.constant 0 : index
    %c0_11 = arith.constant 0 : index
    %c0_12 = arith.constant 0 : index
    %25 = vector.load %arg6[%c0_9, %c0_10, %c0_11, %c0_12] : memref<1x7x32x32xbf16, #tpu.memory_space<vmem>>, vector<1x1x32x32xbf16>
    %26 = vector.shape_cast %25 : vector<1x1x32x32xbf16> to vector<32x32xbf16>
    %27 = arith.truncf %24 : vector<16x32xf32> to vector<16x32xbf16>
    %cst_13 = arith.constant dense<0.000000e+00> : vector<16x32xf32>
    %28 = tpu.matmul %27, %26, %cst_13 {dimension_numbers = #tpu.dot_dimension_numbers<[1], [0], [0], [1], [0, 0, 1, 1], [], []>} : vector<16x32xbf16>, vector<32x32xbf16>, vector<16x32xf32> -> vector<16x32xf32>
    %29 = arith.addf %23, %28 : vector<16x32xf32>
    %30 = vector.extract_strided_slice %2 {offsets = [3, 0], sizes = [1, 32], strides = [1, 1]} : vector<16x32xf32> to vector<1x32xf32>
    %31 = vector.broadcast %30 : vector<1x32xf32> to vector<16x32xf32>
    %32 = arith.addf %29, %31 : vector<16x32xf32>
    %33 = vector.extract_strided_slice %2 {offsets = [4, 0], sizes = [1, 32], strides = [1, 1]} : vector<16x32xf32> to vector<1x32xf32>
    %34 = vector.extract_strided_slice %2 {offsets = [5, 0], sizes = [1, 32], strides = [1, 1]} : vector<16x32xf32> to vector<1x32xf32>
    %cst_14 = arith.constant dense<0.000000e+00> : vector<16xf32>
    %35 = vector.multi_reduction <add>, %32, %cst_14 [1] : vector<16x32xf32> to vector<16xf32>
    %36 = vector.shape_cast %35 : vector<16xf32> to vector<16x1xf32>
    %cst_15 = arith.constant 3.200000e+01 : f32
    %37 = vector.broadcast %cst_15 : f32 to vector<16x1xf32>
    %38 = arith.divf %36, %37 : vector<16x1xf32>
    %39 = vector.broadcast %38 : vector<16x1xf32> to vector<16x32xf32>
    %40 = arith.subf %32, %39 : vector<16x32xf32>
    %41 = arith.mulf %40, %40 : vector<16x32xf32>
    %cst_16 = arith.constant dense<0.000000e+00> : vector<16xf32>
    %42 = vector.multi_reduction <add>, %41, %cst_16 [1] : vector<16x32xf32> to vector<16xf32>
    %43 = vector.shape_cast %42 : vector<16xf32> to vector<16x1xf32>
    %cst_17 = arith.constant 3.200000e+01 : f32
    %44 = vector.broadcast %cst_17 : f32 to vector<16x1xf32>
    %45 = arith.divf %43, %44 : vector<16x1xf32>
    %cst_18 = arith.constant 9.99999974E-6 : f32
    %46 = vector.broadcast %cst_18 : f32 to vector<16x1xf32>
    %47 = arith.addf %45, %46 : vector<16x1xf32>
    %48 = math.rsqrt %47 : vector<16x1xf32>
    %49 = vector.broadcast %48 : vector<16x1xf32> to vector<16x32xf32>
    %50 = arith.mulf %40, %49 : vector<16x32xf32>
    %51 = vector.broadcast %33 : vector<1x32xf32> to vector<16x32xf32>
    %52 = arith.mulf %50, %51 : vector<16x32xf32>
    %53 = vector.broadcast %34 : vector<1x32xf32> to vector<16x32xf32>
    %54 = arith.addf %52, %53 : vector<16x32xf32>
    %c0_19 = arith.constant 0 : index
    %c1 = arith.constant 1 : index
    %c0_20 = arith.constant 0 : index
    %c0_21 = arith.constant 0 : index
    %55 = vector.load %arg6[%c0_19, %c1, %c0_20, %c0_21] : memref<1x7x32x32xbf16, #tpu.memory_space<vmem>>, vector<1x1x32x32xbf16>
    %56 = vector.shape_cast %55 : vector<1x1x32x32xbf16> to vector<32x32xbf16>
    %57 = arith.truncf %54 : vector<16x32xf32> to vector<16x32xbf16>
    %cst_22 = arith.constant dense<0.000000e+00> : vector<16x32xf32>
    %58 = tpu.matmul %57, %56, %cst_22 {dimension_numbers = #tpu.dot_dimension_numbers<[1], [0], [0], [1], [0, 0, 1, 1], [], []>} : vector<16x32xbf16>, vector<32x32xbf16>, vector<16x32xf32> -> vector<16x32xf32>
    %59 = vector.extract_strided_slice %2 {offsets = [8, 0], sizes = [1, 32], strides = [1, 1]} : vector<16x32xf32> to vector<1x32xf32>
    %60 = vector.broadcast %59 : vector<1x32xf32> to vector<16x32xf32>
    %61 = arith.addf %58, %60 : vector<16x32xf32>
    %c0_23 = arith.constant 0 : index
    %c2 = arith.constant 2 : index
    %c0_24 = arith.constant 0 : index
    %c0_25 = arith.constant 0 : index
    %62 = vector.load %arg6[%c0_23, %c2, %c0_24, %c0_25] : memref<1x7x32x32xbf16, #tpu.memory_space<vmem>>, vector<1x1x32x32xbf16>
    %63 = vector.shape_cast %62 : vector<1x1x32x32xbf16> to vector<32x32xbf16>
    %64 = arith.truncf %54 : vector<16x32xf32> to vector<16x32xbf16>
    %cst_26 = arith.constant dense<0.000000e+00> : vector<16x32xf32>
    %65 = tpu.matmul %64, %63, %cst_26 {dimension_numbers = #tpu.dot_dimension_numbers<[1], [0], [0], [1], [0, 0, 1, 1], [], []>} : vector<16x32xbf16>, vector<32x32xbf16>, vector<16x32xf32> -> vector<16x32xf32>
    %66 = vector.extract_strided_slice %2 {offsets = [9, 0], sizes = [1, 32], strides = [1, 1]} : vector<16x32xf32> to vector<1x32xf32>
    %67 = vector.broadcast %66 : vector<1x32xf32> to vector<16x32xf32>
    %68 = arith.addf %65, %67 : vector<16x32xf32>
    %c0_27 = arith.constant 0 : index
    %c3 = arith.constant 3 : index
    %c0_28 = arith.constant 0 : index
    %c0_29 = arith.constant 0 : index
    %69 = vector.load %arg6[%c0_27, %c3, %c0_28, %c0_29] : memref<1x7x32x32xbf16, #tpu.memory_space<vmem>>, vector<1x1x32x32xbf16>
    %70 = vector.shape_cast %69 : vector<1x1x32x32xbf16> to vector<32x32xbf16>
    %71 = arith.truncf %54 : vector<16x32xf32> to vector<16x32xbf16>
    %cst_30 = arith.constant dense<0.000000e+00> : vector<16x32xf32>
    %72 = tpu.matmul %71, %70, %cst_30 {dimension_numbers = #tpu.dot_dimension_numbers<[1], [0], [0], [1], [0, 0, 1, 1], [], []>} : vector<16x32xbf16>, vector<32x32xbf16>, vector<16x32xf32> -> vector<16x32xf32>
    %73 = vector.extract_strided_slice %2 {offsets = [10, 0], sizes = [1, 32], strides = [1, 1]} : vector<16x32xf32> to vector<1x32xf32>
    %74 = vector.broadcast %73 : vector<1x32xf32> to vector<16x32xf32>
    %75 = arith.addf %72, %74 : vector<16x32xf32>
    %76 = arith.truncf %61 : vector<16x32xf32> to vector<16x32xbf16>
    %77 = arith.truncf %68 : vector<16x32xf32> to vector<16x32xbf16>
    %cst_31 = arith.constant dense<0.000000e+00> : vector<16x16xf32>
    %78 = tpu.matmul %76, %77, %cst_31 {dimension_numbers = #tpu.dot_dimension_numbers<[1], [1], [0], [0], [0, 0, 1, 0], [], []>} : vector<16x32xbf16>, vector<16x32xbf16>, vector<16x16xf32> -> vector<16x16xf32>
    %cst_32 = arith.constant dense<0xFF800000> : vector<16xf32>
    %79 = vector.multi_reduction <maximumf>, %78, %cst_32 [1] : vector<16x16xf32> to vector<16xf32>
    %80 = vector.shape_cast %79 : vector<16xf32> to vector<16x1xf32>
    %81 = vector.broadcast %80 : vector<16x1xf32> to vector<16x16xf32>
    %82 = arith.subf %78, %81 : vector<16x16xf32>
    %83 = math.exp %82 : vector<16x16xf32>
    %cst_33 = arith.constant dense<0.000000e+00> : vector<16xf32>
    %84 = vector.multi_reduction <add>, %83, %cst_33 [1] : vector<16x16xf32> to vector<16xf32>
    %85 = vector.shape_cast %84 : vector<16xf32> to vector<16x1xf32>
    %86 = tpu.reciprocal %85 {approx = true} : vector<16x1xf32> -> vector<16x1xf32>
    %87 = vector.broadcast %86 : vector<16x1xf32> to vector<16x16xf32>
    %88 = arith.mulf %83, %87 : vector<16x16xf32>
    %89 = arith.truncf %88 : vector<16x16xf32> to vector<16x16xbf16>
    %90 = arith.truncf %75 : vector<16x32xf32> to vector<16x32xbf16>
    %cst_34 = arith.constant dense<0.000000e+00> : vector<16x32xf32>
    %91 = tpu.matmul %89, %90, %cst_34 {dimension_numbers = #tpu.dot_dimension_numbers<[1], [0], [0], [1], [0, 0, 1, 1], [], []>} : vector<16x16xbf16>, vector<16x32xbf16>, vector<16x32xf32> -> vector<16x32xf32>
    %c0_35 = arith.constant 0 : index
    %c4 = arith.constant 4 : index
    %c0_36 = arith.constant 0 : index
    %c0_37 = arith.constant 0 : index
    %92 = vector.load %arg6[%c0_35, %c4, %c0_36, %c0_37] : memref<1x7x32x32xbf16, #tpu.memory_space<vmem>>, vector<1x1x32x32xbf16>
    %93 = vector.shape_cast %92 : vector<1x1x32x32xbf16> to vector<32x32xbf16>
    %94 = arith.truncf %91 : vector<16x32xf32> to vector<16x32xbf16>
    %cst_38 = arith.constant dense<0.000000e+00> : vector<16x32xf32>
    %95 = tpu.matmul %94, %93, %cst_38 {dimension_numbers = #tpu.dot_dimension_numbers<[1], [0], [0], [1], [0, 0, 1, 1], [], []>} : vector<16x32xbf16>, vector<32x32xbf16>, vector<16x32xf32> -> vector<16x32xf32>
    %96 = arith.addf %32, %95 : vector<16x32xf32>
    %97 = vector.extract_strided_slice %2 {offsets = [11, 0], sizes = [1, 32], strides = [1, 1]} : vector<16x32xf32> to vector<1x32xf32>
    %98 = vector.broadcast %97 : vector<1x32xf32> to vector<16x32xf32>
    %99 = arith.addf %96, %98 : vector<16x32xf32>
    %100 = vector.extract_strided_slice %2 {offsets = [6, 0], sizes = [1, 32], strides = [1, 1]} : vector<16x32xf32> to vector<1x32xf32>
    %101 = vector.extract_strided_slice %2 {offsets = [7, 0], sizes = [1, 32], strides = [1, 1]} : vector<16x32xf32> to vector<1x32xf32>
    %cst_39 = arith.constant dense<0.000000e+00> : vector<16xf32>
    %102 = vector.multi_reduction <add>, %99, %cst_39 [1] : vector<16x32xf32> to vector<16xf32>
    %103 = vector.shape_cast %102 : vector<16xf32> to vector<16x1xf32>
    %cst_40 = arith.constant 3.200000e+01 : f32
    %104 = vector.broadcast %cst_40 : f32 to vector<16x1xf32>
    %105 = arith.divf %103, %104 : vector<16x1xf32>
    %106 = vector.broadcast %105 : vector<16x1xf32> to vector<16x32xf32>
    %107 = arith.subf %99, %106 : vector<16x32xf32>
    %108 = arith.mulf %107, %107 : vector<16x32xf32>
    %cst_41 = arith.constant dense<0.000000e+00> : vector<16xf32>
    %109 = vector.multi_reduction <add>, %108, %cst_41 [1] : vector<16x32xf32> to vector<16xf32>
    %110 = vector.shape_cast %109 : vector<16xf32> to vector<16x1xf32>
    %cst_42 = arith.constant 3.200000e+01 : f32
    %111 = vector.broadcast %cst_42 : f32 to vector<16x1xf32>
    %112 = arith.divf %110, %111 : vector<16x1xf32>
    %cst_43 = arith.constant 9.99999974E-6 : f32
    %113 = vector.broadcast %cst_43 : f32 to vector<16x1xf32>
    %114 = arith.addf %112, %113 : vector<16x1xf32>
    %115 = math.rsqrt %114 : vector<16x1xf32>
    %116 = vector.broadcast %115 : vector<16x1xf32> to vector<16x32xf32>
    %117 = arith.mulf %107, %116 : vector<16x32xf32>
    %118 = vector.broadcast %100 : vector<1x32xf32> to vector<16x32xf32>
    %119 = arith.mulf %117, %118 : vector<16x32xf32>
    %120 = vector.broadcast %101 : vector<1x32xf32> to vector<16x32xf32>
    %121 = arith.addf %119, %120 : vector<16x32xf32>
    %c0_44 = arith.constant 0 : index
    %c5 = arith.constant 5 : index
    %c0_45 = arith.constant 0 : index
    %c0_46 = arith.constant 0 : index
    %122 = vector.load %arg6[%c0_44, %c5, %c0_45, %c0_46] : memref<1x7x32x32xbf16, #tpu.memory_space<vmem>>, vector<1x1x32x32xbf16>
    %123 = vector.shape_cast %122 : vector<1x1x32x32xbf16> to vector<32x32xbf16>
    %124 = arith.truncf %121 : vector<16x32xf32> to vector<16x32xbf16>
    %cst_47 = arith.constant dense<0.000000e+00> : vector<16x32xf32>
    %125 = tpu.matmul %124, %123, %cst_47 {dimension_numbers = #tpu.dot_dimension_numbers<[1], [0], [0], [1], [0, 0, 1, 1], [], []>} : vector<16x32xbf16>, vector<32x32xbf16>, vector<16x32xf32> -> vector<16x32xf32>
    %126 = vector.extract_strided_slice %2 {offsets = [12, 0], sizes = [1, 32], strides = [1, 1]} : vector<16x32xf32> to vector<1x32xf32>
    %127 = vector.broadcast %126 : vector<1x32xf32> to vector<16x32xf32>
    %128 = arith.addf %125, %127 : vector<16x32xf32>
    %cst_48 = arith.constant 5.000000e-01 : f32
    %129 = vector.broadcast %cst_48 : f32 to vector<16x32xf32>
    %130 = arith.mulf %129, %128 : vector<16x32xf32>
    %cst_49 = arith.constant 4.471500e-02 : f32
    %131 = vector.broadcast %cst_49 : f32 to vector<16x32xf32>
    %132 = arith.mulf %131, %128 : vector<16x32xf32>
    %133 = arith.mulf %132, %128 : vector<16x32xf32>
    %134 = arith.mulf %133, %128 : vector<16x32xf32>
    %135 = arith.addf %128, %134 : vector<16x32xf32>
    %cst_50 = arith.constant 0.797884583 : f32
    %136 = vector.broadcast %cst_50 : f32 to vector<16x32xf32>
    %137 = arith.mulf %136, %135 : vector<16x32xf32>
    %138 = math.tanh %137 : vector<16x32xf32>
    %cst_51 = arith.constant 1.000000e+00 : f32
    %139 = vector.broadcast %cst_51 : f32 to vector<16x32xf32>
    %140 = arith.addf %139, %138 : vector<16x32xf32>
    %141 = arith.mulf %130, %140 : vector<16x32xf32>
    %c0_52 = arith.constant 0 : index
    %c6 = arith.constant 6 : index
    %c0_53 = arith.constant 0 : index
    %c0_54 = arith.constant 0 : index
    %142 = vector.load %arg6[%c0_52, %c6, %c0_53, %c0_54] : memref<1x7x32x32xbf16, #tpu.memory_space<vmem>>, vector<1x1x32x32xbf16>
    %143 = vector.shape_cast %142 : vector<1x1x32x32xbf16> to vector<32x32xbf16>
    %144 = arith.truncf %141 : vector<16x32xf32> to vector<16x32xbf16>
    %cst_55 = arith.constant dense<0.000000e+00> : vector<16x32xf32>
    %145 = tpu.matmul %144, %143, %cst_55 {dimension_numbers = #tpu.dot_dimension_numbers<[1], [0], [0], [1], [0, 0, 1, 1], [], []>} : vector<16x32xbf16>, vector<32x32xbf16>, vector<16x32xf32> -> vector<16x32xf32>
    %146 = vector.extract_strided_slice %2 {offsets = [13, 0], sizes = [1, 32], strides = [1, 1]} : vector<16x32xf32> to vector<1x32xf32>
    %147 = vector.broadcast %146 : vector<1x32xf32> to vector<16x32xf32>
    %148 = arith.addf %145, %147 : vector<16x32xf32>
    %149 = arith.addf %99, %148 : vector<16x32xf32>
    %150 = vector.extract_strided_slice %2 {offsets = [14, 0], sizes = [1, 32], strides = [1, 1]} : vector<16x32xf32> to vector<1x32xf32>
    %151 = arith.truncf %150 : vector<1x32xf32> to vector<1x32xbf16>
    %152 = arith.truncf %149 : vector<16x32xf32> to vector<16x32xbf16>
    %cst_56 = arith.constant dense<0.000000e+00> : vector<1x16xf32>
    %153 = tpu.matmul %151, %152, %cst_56 {dimension_numbers = #tpu.dot_dimension_numbers<[1], [1], [0], [0], [0, 0, 1, 0], [], []>} : vector<1x32xbf16>, vector<16x32xbf16>, vector<1x16xf32> -> vector<1x16xf32>
    %154 = vector.extract_strided_slice %2 {offsets = [15, 0], sizes = [1, 1], strides = [1, 1]} : vector<16x32xf32> to vector<1x1xf32>
    %155 = vector.broadcast %154 : vector<1x1xf32> to vector<1x16xf32>
    %156 = arith.addf %153, %155 : vector<1x16xf32>
    %c0_57 = arith.constant 0 : index
    %c0_58 = arith.constant 0 : index
    %157 = vector.load %arg2[%c0_57, %c0_58] : memref<16x16xbf16, #tpu.memory_space<vmem>>, vector<16x16xbf16>
    %158 = arith.extf %157 : vector<16x16xbf16> to vector<16x16xf32>
    %159 = vector.broadcast %156 : vector<1x16xf32> to vector<16x16xf32>
    %160 = arith.mulf %158, %159 : vector<16x16xf32>
    %161 = arith.truncf %160 : vector<16x16xf32> to vector<16x16xbf16>
    %162 = arith.truncf %158 : vector<16x16xf32> to vector<16x16xbf16>
    %cst_59 = arith.constant dense<0.000000e+00> : vector<16x16xf32>
    %163 = tpu.matmul %161, %162, %cst_59 {dimension_numbers = #tpu.dot_dimension_numbers<[1], [1], [0], [0], [0, 0, 1, 0], [], []>} : vector<16x16xbf16>, vector<16x16xbf16>, vector<16x16xf32> -> vector<16x16xf32>
    %164 = arith.truncf %163 : vector<16x16xf32> to vector<16x16xbf16>
    %165 = arith.truncf %12 : vector<16x32xf32> to vector<16x32xbf16>
    %cst_60 = arith.constant dense<0.000000e+00> : vector<16x32xf32>
    %166 = tpu.matmul %164, %165, %cst_60 {dimension_numbers = #tpu.dot_dimension_numbers<[1], [0], [0], [1], [0, 0, 1, 1], [], []>} : vector<16x16xbf16>, vector<16x32xbf16>, vector<16x32xf32> -> vector<16x32xf32>
    %167 = arith.addf %12, %166 : vector<16x32xf32>
    %c0_61 = arith.constant 0 : index
    %c0_62 = arith.constant 0 : index
    %c0_63 = arith.constant 0 : index
    %c0_64 = arith.constant 0 : index
    %168 = vector.load %arg7[%c0_61, %c0_62, %c0_63, %c0_64] : memref<1x1x35x32xf32, #tpu.memory_space<vmem>>, vector<1x1x35x32xf32>
    %169 = vector.shape_cast %168 : vector<1x1x35x32xf32> to vector<35x32xf32>
    %170 = vector.extract_strided_slice %169 {offsets = [0, 0], sizes = [32, 32], strides = [1, 1]} : vector<35x32xf32> to vector<32x32xf32>
    %171 = vector.extract_strided_slice %169 {offsets = [32, 0], sizes = [1, 32], strides = [1, 1]} : vector<35x32xf32> to vector<1x32xf32>
    %172 = vector.extract_strided_slice %169 {offsets = [33, 0], sizes = [1, 32], strides = [1, 1]} : vector<35x32xf32> to vector<1x32xf32>
    %173 = vector.extract_strided_slice %169 {offsets = [34, 0], sizes = [1, 32], strides = [1, 1]} : vector<35x32xf32> to vector<1x32xf32>
    %174 = arith.truncf %167 : vector<16x32xf32> to vector<16x32xbf16>
    %175 = arith.truncf %170 : vector<32x32xf32> to vector<32x32xbf16>
    %cst_65 = arith.constant dense<0.000000e+00> : vector<16x32xf32>
    %176 = tpu.matmul %174, %175, %cst_65 {dimension_numbers = #tpu.dot_dimension_numbers<[1], [0], [0], [1], [0, 0, 1, 1], [], []>} : vector<16x32xbf16>, vector<32x32xbf16>, vector<16x32xf32> -> vector<16x32xf32>
    %177 = vector.broadcast %171 : vector<1x32xf32> to vector<16x32xf32>
    %178 = arith.addf %176, %177 : vector<16x32xf32>
    %cst_66 = arith.constant dense<0.000000e+00> : vector<16xf32>
    %179 = vector.multi_reduction <add>, %178, %cst_66 [1] : vector<16x32xf32> to vector<16xf32>
    %180 = vector.shape_cast %179 : vector<16xf32> to vector<16x1xf32>
    %cst_67 = arith.constant 3.200000e+01 : f32
    %181 = vector.broadcast %cst_67 : f32 to vector<16x1xf32>
    %182 = arith.divf %180, %181 : vector<16x1xf32>
    %183 = vector.broadcast %182 : vector<16x1xf32> to vector<16x32xf32>
    %184 = arith.subf %178, %183 : vector<16x32xf32>
    %185 = arith.mulf %184, %184 : vector<16x32xf32>
    %cst_68 = arith.constant dense<0.000000e+00> : vector<16xf32>
    %186 = vector.multi_reduction <add>, %185, %cst_68 [1] : vector<16x32xf32> to vector<16xf32>
    %187 = vector.shape_cast %186 : vector<16xf32> to vector<16x1xf32>
    %cst_69 = arith.constant 3.200000e+01 : f32
    %188 = vector.broadcast %cst_69 : f32 to vector<16x1xf32>
    %189 = arith.divf %187, %188 : vector<16x1xf32>
    %cst_70 = arith.constant 9.99999974E-6 : f32
    %190 = vector.broadcast %cst_70 : f32 to vector<16x1xf32>
    %191 = arith.addf %189, %190 : vector<16x1xf32>
    %192 = math.rsqrt %191 : vector<16x1xf32>
    %193 = vector.broadcast %192 : vector<16x1xf32> to vector<16x32xf32>
    %194 = arith.mulf %184, %193 : vector<16x32xf32>
    %195 = vector.broadcast %172 : vector<1x32xf32> to vector<16x32xf32>
    %196 = arith.mulf %194, %195 : vector<16x32xf32>
    %197 = vector.broadcast %173 : vector<1x32xf32> to vector<16x32xf32>
    %198 = arith.addf %196, %197 : vector<16x32xf32>
    %cst_71 = arith.constant 5.000000e-01 : f32
    %199 = vector.broadcast %cst_71 : f32 to vector<16x32xf32>
    %200 = arith.mulf %199, %198 : vector<16x32xf32>
    %cst_72 = arith.constant 4.471500e-02 : f32
    %201 = vector.broadcast %cst_72 : f32 to vector<16x32xf32>
    %202 = arith.mulf %201, %198 : vector<16x32xf32>
    %203 = arith.mulf %202, %198 : vector<16x32xf32>
    %204 = arith.mulf %203, %198 : vector<16x32xf32>
    %205 = arith.addf %198, %204 : vector<16x32xf32>
    %cst_73 = arith.constant 0.797884583 : f32
    %206 = vector.broadcast %cst_73 : f32 to vector<16x32xf32>
    %207 = arith.mulf %206, %205 : vector<16x32xf32>
    %208 = math.tanh %207 : vector<16x32xf32>
    %cst_74 = arith.constant 1.000000e+00 : f32
    %209 = vector.broadcast %cst_74 : f32 to vector<16x32xf32>
    %210 = arith.addf %209, %208 : vector<16x32xf32>
    %211 = arith.mulf %200, %210 : vector<16x32xf32>
    %212 = arith.truncf %163 : vector<16x16xf32> to vector<16x16xbf16>
    %213 = arith.truncf %211 : vector<16x32xf32> to vector<16x32xbf16>
    %cst_75 = arith.constant dense<0.000000e+00> : vector<16x32xf32>
    %214 = tpu.matmul %212, %213, %cst_75 {dimension_numbers = #tpu.dot_dimension_numbers<[1], [0], [0], [1], [0, 0, 1, 1], [], []>} : vector<16x16xbf16>, vector<16x32xbf16>, vector<16x32xf32> -> vector<16x32xf32>
    %215 = arith.addf %211, %214 : vector<16x32xf32>
    %c0_i32 = arith.constant 0 : i32
    %216 = arith.cmpi eq, %arg0, %c0_i32 : i32
    %217 = arith.extui %216 : i1 to i32
    %c0_i32_76 = arith.constant 0 : i32
    %218 = arith.cmpi ne, %217, %c0_i32_76 : i32
    scf.if %218 {
      %c0_78 = arith.constant 0 : index
      %c0_79 = arith.constant 0 : index
      %222 = vector.load %arg8[%c0_78, %c0_79] : memref<35x16xf32, #tpu.memory_space<vmem>>, vector<35x16xf32>
      %223 = vector.extract_strided_slice %222 {offsets = [0, 0], sizes = [32, 16], strides = [1, 1]} : vector<35x16xf32> to vector<32x16xf32>
      %224 = vector.extract_strided_slice %222 {offsets = [32, 0], sizes = [1, 16], strides = [1, 1]} : vector<35x16xf32> to vector<1x16xf32>
      %225 = vector.extract_strided_slice %222 {offsets = [33, 0], sizes = [1, 16], strides = [1, 1]} : vector<35x16xf32> to vector<1x16xf32>
      %226 = vector.extract_strided_slice %222 {offsets = [34, 0], sizes = [1, 16], strides = [1, 1]} : vector<35x16xf32> to vector<1x16xf32>
      %227 = arith.truncf %215 : vector<16x32xf32> to vector<16x32xbf16>
      %228 = arith.truncf %223 : vector<32x16xf32> to vector<32x16xbf16>
      %cst_80 = arith.constant dense<0.000000e+00> : vector<16x16xf32>
      %229 = tpu.matmul %227, %228, %cst_80 {dimension_numbers = #tpu.dot_dimension_numbers<[1], [0], [0], [1], [0, 0, 1, 1], [], []>} : vector<16x32xbf16>, vector<32x16xbf16>, vector<16x16xf32> -> vector<16x16xf32>
      %230 = vector.broadcast %224 : vector<1x16xf32> to vector<16x16xf32>
      %231 = arith.addf %229, %230 : vector<16x16xf32>
      %cst_81 = arith.constant dense<0.000000e+00> : vector<16xf32>
      %232 = vector.multi_reduction <add>, %231, %cst_81 [1] : vector<16x16xf32> to vector<16xf32>
      %233 = vector.shape_cast %232 : vector<16xf32> to vector<16x1xf32>
      %cst_82 = arith.constant 1.600000e+01 : f32
      %234 = vector.broadcast %cst_82 : f32 to vector<16x1xf32>
      %235 = arith.divf %233, %234 : vector<16x1xf32>
      %236 = vector.broadcast %235 : vector<16x1xf32> to vector<16x16xf32>
      %237 = arith.subf %231, %236 : vector<16x16xf32>
      %238 = arith.mulf %237, %237 : vector<16x16xf32>
      %cst_83 = arith.constant dense<0.000000e+00> : vector<16xf32>
      %239 = vector.multi_reduction <add>, %238, %cst_83 [1] : vector<16x16xf32> to vector<16xf32>
      %240 = vector.shape_cast %239 : vector<16xf32> to vector<16x1xf32>
      %cst_84 = arith.constant 1.600000e+01 : f32
      %241 = vector.broadcast %cst_84 : f32 to vector<16x1xf32>
      %242 = arith.divf %240, %241 : vector<16x1xf32>
      %cst_85 = arith.constant 9.99999974E-6 : f32
      %243 = vector.broadcast %cst_85 : f32 to vector<16x1xf32>
      %244 = arith.addf %242, %243 : vector<16x1xf32>
      %245 = math.rsqrt %244 : vector<16x1xf32>
      %246 = vector.broadcast %245 : vector<16x1xf32> to vector<16x16xf32>
      %247 = arith.mulf %237, %246 : vector<16x16xf32>
      %248 = vector.broadcast %225 : vector<1x16xf32> to vector<16x16xf32>
      %249 = arith.mulf %247, %248 : vector<16x16xf32>
      %250 = vector.broadcast %226 : vector<1x16xf32> to vector<16x16xf32>
      %251 = arith.addf %249, %250 : vector<16x16xf32>
      %cst_86 = arith.constant 5.000000e-01 : f32
      %252 = vector.broadcast %cst_86 : f32 to vector<16x16xf32>
      %253 = arith.mulf %252, %251 : vector<16x16xf32>
      %cst_87 = arith.constant 4.471500e-02 : f32
      %254 = vector.broadcast %cst_87 : f32 to vector<16x16xf32>
      %255 = arith.mulf %254, %251 : vector<16x16xf32>
      %256 = arith.mulf %255, %251 : vector<16x16xf32>
      %257 = arith.mulf %256, %251 : vector<16x16xf32>
      %258 = arith.addf %251, %257 : vector<16x16xf32>
      %cst_88 = arith.constant 0.797884583 : f32
      %259 = vector.broadcast %cst_88 : f32 to vector<16x16xf32>
      %260 = arith.mulf %259, %258 : vector<16x16xf32>
      %261 = math.tanh %260 : vector<16x16xf32>
      %cst_89 = arith.constant 1.000000e+00 : f32
      %262 = vector.broadcast %cst_89 : f32 to vector<16x16xf32>
      %263 = arith.addf %262, %261 : vector<16x16xf32>
      %264 = arith.mulf %253, %263 : vector<16x16xf32>
      %c0_90 = arith.constant 0 : index
      %c0_91 = arith.constant 0 : index
      %265 = vector.load %arg9[%c0_90, %c0_91] : memref<17x1xf32, #tpu.memory_space<vmem>>, vector<17x1xf32>
      %266 = vector.extract_strided_slice %265 {offsets = [0, 0], sizes = [16, 1], strides = [1, 1]} : vector<17x1xf32> to vector<16x1xf32>
      %267 = arith.truncf %264 : vector<16x16xf32> to vector<16x16xbf16>
      %268 = arith.truncf %266 : vector<16x1xf32> to vector<16x1xbf16>
      %cst_92 = arith.constant dense<0.000000e+00> : vector<16x1xf32>
      %269 = tpu.matmul %267, %268, %cst_92 {dimension_numbers = #tpu.dot_dimension_numbers<[1], [0], [0], [1], [0, 0, 1, 1], [], []>} : vector<16x16xbf16>, vector<16x1xbf16>, vector<16x1xf32> -> vector<16x1xf32>
      %270 = vector.extract_strided_slice %265 {offsets = [16, 0], sizes = [1, 1], strides = [1, 1]} : vector<17x1xf32> to vector<1x1xf32>
      %271 = vector.broadcast %270 : vector<1x1xf32> to vector<16x1xf32>
      %272 = arith.addf %269, %271 : vector<16x1xf32>
      %c0_93 = arith.constant 0 : index
      %c0_94 = arith.constant 0 : index
      %c0_95 = arith.constant 0 : index
      %273 = vector.load %arg12[%c0_93, %c0_94, %c0_95] : memref<1x16x1xf32, #tpu.memory_space<vmem>>, vector<1x16x1xf32>
      %274 = vector.shape_cast %273 : vector<1x16x1xf32> to vector<16x1xf32>
      %275 = vector.shape_cast %272 : vector<16x1xf32> to vector<1x16x1xf32>
      tpu.vector_store %arg12[%c0_93, %c0_94, %c0_95], %275 {strides = array<i32>} : memref<1x16x1xf32, #tpu.memory_space<vmem>>, vector<1x16x1xf32>,
    } else {
    }
    %c1_i32 = arith.constant 1 : i32
    %219 = arith.cmpi eq, %arg0, %c1_i32 : i32
    %220 = arith.extui %219 : i1 to i32
    %c0_i32_77 = arith.constant 0 : i32
    %221 = arith.cmpi ne, %220, %c0_i32_77 : i32
    scf.if %221 {
      %c0_78 = arith.constant 0 : index
      %c0_79 = arith.constant 0 : index
      %222 = vector.load %arg10[%c0_78, %c0_79] : memref<35x32xf32, #tpu.memory_space<vmem>>, vector<35x32xf32>
      %223 = vector.extract_strided_slice %222 {offsets = [0, 0], sizes = [32, 32], strides = [1, 1]} : vector<35x32xf32> to vector<32x32xf32>
      %224 = vector.extract_strided_slice %222 {offsets = [32, 0], sizes = [1, 32], strides = [1, 1]} : vector<35x32xf32> to vector<1x32xf32>
      %225 = vector.extract_strided_slice %222 {offsets = [33, 0], sizes = [1, 32], strides = [1, 1]} : vector<35x32xf32> to vector<1x32xf32>
      %226 = vector.extract_strided_slice %222 {offsets = [34, 0], sizes = [1, 32], strides = [1, 1]} : vector<35x32xf32> to vector<1x32xf32>
      %227 = arith.truncf %215 : vector<16x32xf32> to vector<16x32xbf16>
      %228 = arith.truncf %223 : vector<32x32xf32> to vector<32x32xbf16>
      %cst_80 = arith.constant dense<0.000000e+00> : vector<16x32xf32>
      %229 = tpu.matmul %227, %228, %cst_80 {dimension_numbers = #tpu.dot_dimension_numbers<[1], [0], [0], [1], [0, 0, 1, 1], [], []>} : vector<16x32xbf16>, vector<32x32xbf16>, vector<16x32xf32> -> vector<16x32xf32>
      %230 = vector.broadcast %224 : vector<1x32xf32> to vector<16x32xf32>
      %231 = arith.addf %229, %230 : vector<16x32xf32>
      %cst_81 = arith.constant dense<0.000000e+00> : vector<16xf32>
      %232 = vector.multi_reduction <add>, %231, %cst_81 [1] : vector<16x32xf32> to vector<16xf32>
      %233 = vector.shape_cast %232 : vector<16xf32> to vector<16x1xf32>
      %cst_82 = arith.constant 3.200000e+01 : f32
      %234 = vector.broadcast %cst_82 : f32 to vector<16x1xf32>
      %235 = arith.divf %233, %234 : vector<16x1xf32>
      %236 = vector.broadcast %235 : vector<16x1xf32> to vector<16x32xf32>
      %237 = arith.subf %231, %236 : vector<16x32xf32>
      %238 = arith.mulf %237, %237 : vector<16x32xf32>
      %cst_83 = arith.constant dense<0.000000e+00> : vector<16xf32>
      %239 = vector.multi_reduction <add>, %238, %cst_83 [1] : vector<16x32xf32> to vector<16xf32>
      %240 = vector.shape_cast %239 : vector<16xf32> to vector<16x1xf32>
      %cst_84 = arith.constant 3.200000e+01 : f32
      %241 = vector.broadcast %cst_84 : f32 to vector<16x1xf32>
      %242 = arith.divf %240, %241 : vector<16x1xf32>
      %cst_85 = arith.constant 9.99999974E-6 : f32
      %243 = vector.broadcast %cst_85 : f32 to vector<16x1xf32>
      %244 = arith.addf %242, %243 : vector<16x1xf32>
      %245 = math.rsqrt %244 : vector<16x1xf32>
      %246 = vector.broadcast %245 : vector<16x1xf32> to vector<16x32xf32>
      %247 = arith.mulf %237, %246 : vector<16x32xf32>
      %248 = vector.broadcast %225 : vector<1x32xf32> to vector<16x32xf32>
      %249 = arith.mulf %247, %248 : vector<16x32xf32>
      %250 = vector.broadcast %226 : vector<1x32xf32> to vector<16x32xf32>
      %251 = arith.addf %249, %250 : vector<16x32xf32>
      %cst_86 = arith.constant 5.000000e-01 : f32
      %252 = vector.broadcast %cst_86 : f32 to vector<16x32xf32>
      %253 = arith.mulf %252, %251 : vector<16x32xf32>
      %cst_87 = arith.constant 4.471500e-02 : f32
      %254 = vector.broadcast %cst_87 : f32 to vector<16x32xf32>
      %255 = arith.mulf %254, %251 : vector<16x32xf32>
      %256 = arith.mulf %255, %251 : vector<16x32xf32>
      %257 = arith.mulf %256, %251 : vector<16x32xf32>
      %258 = arith.addf %251, %257 : vector<16x32xf32>
      %cst_88 = arith.constant 0.797884583 : f32
      %259 = vector.broadcast %cst_88 : f32 to vector<16x32xf32>
      %260 = arith.mulf %259, %258 : vector<16x32xf32>
      %261 = math.tanh %260 : vector<16x32xf32>
      %cst_89 = arith.constant 1.000000e+00 : f32
      %262 = vector.broadcast %cst_89 : f32 to vector<16x32xf32>
      %263 = arith.addf %262, %261 : vector<16x32xf32>
      %264 = arith.mulf %253, %263 : vector<16x32xf32>
      %c0_90 = arith.constant 0 : index
      %c0_91 = arith.constant 0 : index
      %265 = vector.load %arg11[%c0_90, %c0_91] : memref<33x1xf32, #tpu.memory_space<vmem>>, vector<33x1xf32>
      %266 = vector.extract_strided_slice %265 {offsets = [0, 0], sizes = [32, 1], strides = [1, 1]} : vector<33x1xf32> to vector<32x1xf32>
      %267 = arith.truncf %264 : vector<16x32xf32> to vector<16x32xbf16>
      %268 = arith.truncf %266 : vector<32x1xf32> to vector<32x1xbf16>
      %cst_92 = arith.constant dense<0.000000e+00> : vector<16x1xf32>
      %269 = tpu.matmul %267, %268, %cst_92 {dimension_numbers = #tpu.dot_dimension_numbers<[1], [0], [0], [1], [0, 0, 1, 1], [], []>} : vector<16x32xbf16>, vector<32x1xbf16>, vector<16x1xf32> -> vector<16x1xf32>
      %270 = vector.extract_strided_slice %265 {offsets = [32, 0], sizes = [1, 1], strides = [1, 1]} : vector<33x1xf32> to vector<1x1xf32>
      %271 = vector.broadcast %270 : vector<1x1xf32> to vector<16x1xf32>
      %272 = arith.addf %269, %271 : vector<16x1xf32>
      %c0_93 = arith.constant 0 : index
      %c0_94 = arith.constant 0 : index
      %c0_95 = arith.constant 0 : index
      %273 = vector.load %arg12[%c0_93, %c0_94, %c0_95] : memref<1x16x1xf32, #tpu.memory_space<vmem>>, vector<1x16x1xf32>
      %274 = vector.shape_cast %273 : vector<1x16x1xf32> to vector<16x1xf32>
      %275 = vector.shape_cast %272 : vector<16x1xf32> to vector<1x16x1xf32>
      tpu.vector_store %arg12[%c0_93, %c0_94, %c0_95], %275 {strides = array<i32>} : memref<1x16x1xf32, #tpu.memory_space<vmem>>, vector<1x16x1xf32>,
    } else {
    }
    return
  }
  func.func @transform_0(%arg0: i32) -> (i32, i32) {
    %c0_i32 = arith.constant 0 : i32
    %c0_i32_0 = arith.constant 0 : i32
    %c0_i32_1 = arith.constant 0 : i32
    return %c0_i32, %c0_i32_0 : i32, i32
  }
  func.func @transform_1(%arg0: i32) -> (i32, i32) {
    %c0_i32 = arith.constant 0 : i32
    %c0_i32_0 = arith.constant 0 : i32
    %c0_i32_1 = arith.constant 0 : i32
    return %c0_i32, %c0_i32_0 : i32, i32
  }
  func.func @transform_2(%arg0: i32) -> (i32, i32) {
    %c0_i32 = arith.constant 0 : i32
    %c0_i32_0 = arith.constant 0 : i32
    %c0_i32_1 = arith.constant 0 : i32
    return %c0_i32, %c0_i32_0 : i32, i32
  }
  func.func @transform_3(%arg0: i32) -> (i32, i32, i32) {
    %c0_i32 = arith.constant 0 : i32
    %c0_i32_0 = arith.constant 0 : i32
    %c0_i32_1 = arith.constant 0 : i32
    return %arg0, %c0_i32, %c0_i32_0 : i32, i32, i32
  }
  func.func @transform_4(%arg0: i32) -> (i32, i32, i32) {
    %c0_i32 = arith.constant 0 : i32
    %c0_i32_0 = arith.constant 0 : i32
    %c0_i32_1 = arith.constant 0 : i32
    return %arg0, %c0_i32, %c0_i32_0 : i32, i32, i32
  }
  func.func @transform_5(%arg0: i32) -> (i32, i32, i32, i32) {
    %c0_i32 = arith.constant 0 : i32
    %c0_i32_0 = arith.constant 0 : i32
    %c0_i32_1 = arith.constant 0 : i32
    %c0_i32_2 = arith.constant 0 : i32
    return %arg0, %c0_i32, %c0_i32_0, %c0_i32_1 : i32, i32, i32, i32
  }
  func.func @transform_6(%arg0: i32) -> (i32, i32, i32, i32) {
    %c0_i32 = arith.constant 0 : i32
    %c0_i32_0 = arith.constant 0 : i32
    %c0_i32_1 = arith.constant 0 : i32
    %c0_i32_2 = arith.constant 0 : i32
    return %arg0, %c0_i32, %c0_i32_0, %c0_i32_1 : i32, i32, i32, i32
  }
  func.func @transform_7(%arg0: i32) -> (i32, i32) {
    %c0_i32 = arith.constant 0 : i32
    %c0_i32_0 = arith.constant 0 : i32
    %c0_i32_1 = arith.constant 0 : i32
    return %c0_i32, %c0_i32_0 : i32, i32
  }
  func.func @transform_8(%arg0: i32) -> (i32, i32) {
    %c0_i32 = arith.constant 0 : i32
    %c0_i32_0 = arith.constant 0 : i32
    %c0_i32_1 = arith.constant 0 : i32
    return %c0_i32, %c0_i32_0 : i32, i32
  }
  func.func @transform_9(%arg0: i32) -> (i32, i32) {
    %c0_i32 = arith.constant 0 : i32
    %c0_i32_0 = arith.constant 0 : i32
    %c0_i32_1 = arith.constant 0 : i32
    return %c0_i32, %c0_i32_0 : i32, i32
  }
  func.func @transform_10(%arg0: i32) -> (i32, i32) {
    %c0_i32 = arith.constant 0 : i32
    %c0_i32_0 = arith.constant 0 : i32
    %c0_i32_1 = arith.constant 0 : i32
    return %c0_i32, %c0_i32_0 : i32, i32
  }
  func.func @transform_11(%arg0: i32) -> (i32, i32, i32) {
    %c0_i32 = arith.constant 0 : i32
    %c0_i32_0 = arith.constant 0 : i32
    %c0_i32_1 = arith.constant 0 : i32
    return %arg0, %c0_i32, %c0_i32_0 : i32, i32, i32
  }
}

</mosaic_0001>

<bundles_post_ra>
// kernel: uniconv_wrapper_forward.1
= control target key start
LH: loop header
LB: loop body
LE: loop exit
PB: predicated region body
PF: predicated region fallthrough
CT: control target
= control target key end

     0   :  { %s2090_s17 = smov 0   ;;  %s2553_s0 = inlined_call_operand.vmem [shape: f32[16,1], index: 0, kind: input, shape index: {}]   ;;  %s2554_s1 = inlined_call_operand.vmem [shape: bf16[16,16], index: 1, kind: input, shape index: {}]   ;;  %s2555_s2 = inlined_call_operand.vmem [shape: f32[16,8], index: 2, kind: input, shape index: {}]   ;;  %s2556_s3 = inlined_call_operand.vmem [shape: f32[2,9,32], index: 3, kind: input, shape index: {}]   ;;  %s2557_s4 = inlined_call_operand.vmem [shape: f32[2,16,32], index: 4, kind: input, shape index: {}]   ;;  %s2558_s5 = inlined_call_operand.vmem [shape: bf16[2,7,32,32], index: 5, kind: input, shape index: {}]   ;;  %s2559_s6 = inlined_call_operand.vmem [shape: f32[2,1,35,32], index: 6, kind: input, shape index: {}]   ;;  %s2560_s7 = inlined_call_operand.vmem [shape: f32[35,16], index: 7, kind: input, shape index: {}]   ;;  %s2561_s8 = inlined_call_operand.vmem [shape: f32[17,1], index: 8, kind: input, shape index: {}]   ;;  %s2562_s9 = inlined_call_operand.vmem [shape: f32[35,32], index: 9, kind: input, shape index: {}]   ;;  %s2563_s10 = inlined_call_operand.vmem [shape: f32[33,1], index: 10, kind: input, shape index: {}]   ;;  %s2564_s11 = inlined_call_operand.vmem [shape: f32[2,16,1], index: 11, kind: output, shape index: {}]  }
   0x1 LB: > { %s2096_s18 = sadd.s32 4294967295, %s2019_s17   ;;  %p1800_p0 = scmp.ge.s32.totalorder %s2019_s17, 1  ;;  %s2019_s17 = sphi %s2090_s17, %s21_s17  }
   0x2   : > { %p367_p1 = scmp.lt.s32.totalorder %s2019_s17, 3 }
   0x4   : > { %p368_p2 = pnand %p1800_p0, %p367_p1 }
   0x5   : > { %p422_p3 = scmp.lt.s32.totalorder (!%p368_p2), %s2096_s18, 1  ;;  %p1914_p4 = scmp.ne.s32.totalorder (!%p368_p2), %s2096_s18, 0 }
   0x6   : > { %371 = sbr.rel (%p368_p2) target bundleno = 4208 (0x1070), region = 64 }
   0xb   : > { %v448_v0 = vld [vmem:[%s2553_s0] sm:$0xff]  ;;  %v2021_v1 = vmov 0   ;;  %s2107_s21 = scalar_select %p422_p3, %s2096_s18, 1  ;;  %v449_v2 = vld [vmem:[%s2553_s0 + $0x8] sm:$0xff]  ;;  %v2022_v29 = vmov 683565275  }
   0xc   : > { %1959 = vset.pattern.permute.xlu0 %v2021_v1  ;;  %1960 = vset.pattern.permute.xlu2 %v2021_v1  ;;  %v2023_v31 = vmov 2475754826   ;;  %v2024_v33 = vmov 2131351028   ;;  %v2025_v35 = vmov 2102212464  }
   0xd   : > { %483 = vperm.xlu0 %1959, %v448_v0   ;;  %s2110_s22 = sshll.u32 %s2107_s21, 4  ;;  %s1940_s12 = smul.u32 112, %s2107_s21  ;;  %v2026_v40 = vmov 920167782   ;;  %v2027_v43 = vmov 1326507024  }
   0xe   : > { %s2116_s25 = scalar_lea.vmem %s2564_s11, %s2110_s22  ;;  %s2125_s30 = scalar_lea.vmem %s2557_s4, %s2110_s22 }
   0xf   : > { %v2128_v3 = vld [vmem:[%s2125_s30] sm:$0xff]  ;;  %s2138_s15 = scalar_lea.vmem %s2558_s5, %s1940_s12  ;;  %s2347_s20 = scalar_lea.vmem %s2556_s3, %s2110_s22 }
  0x10   : > { %v491_v4 = vperm.slane %v2128_v3, 0  ;;  %v494_v5 = vperm.slane %v2128_v3, 1  ;;  %v1926_v9 = vld [vmem:[%s2138_s15 + $0x8] sm:$0xff]  ;;  %v1925_v11 = vld [vmem:[%s2138_s15] sm:$0xff]  ;;  %s1941_s12 = smul.u32 40, %s2107_s21 }
  0x11   : > { %837 = vmatpush.bf16.msra.mxu1 %v1926_v9 }
  0x15   : > { %488 = vperm.xlu0 %1959, %v449_v2   ;;  %838 = vmatpush.bf16.msra.mxu1 %v1925_v11 }
  0x7f   : > { %v2133_v6 = vpop.permute.xlu0 %483 }
  0x80   : > { %v492_v7 = vmul.f32 %v491_v4, %v2133_v6 }
  0x82   : > { %v2141_v8 = vadd.f32 %v494_v5, %v492_v7 }
  0x84   : > { %v503_v10 = vand.u32 2139095040, %v2141_v8  ;;  %v500_v14 = vand.u32 2147483647, %v2141_v8 }
  0x86   : > { %v504_v12 = vshrl.u32 %v503_v10, 23  ;;  %v507_v19 = vand.u32 8388607, %v500_v14 }
  0x87   : > { %v2146_v13 = vpop.permute.xlu0 %488 }
  0x88   : > { %v1810_v15 = vadd.s32 4294967169, %v504_v12  ;;  %v493_v16 = vmul.f32 %v491_v4, %v2146_v13  ;;  %v508_v26 = vor.u32 8388608, %v507_v19 }
  0x8a   : > { %v510_v17 = vadd.s32 1, %v1810_v15  ;;  %v2150_v18 = vadd.f32 %v494_v5, %v493_v16  ;;  %v2162_v52 = vshll.u32 %v508_v26, 8 }
  0x8c   : > { %vm511_vm0 = vcmp.gt.s32.totalorder %v510_v17, 0  ;;  %v655_v20 = vand.u32 2147483647, %v2150_v18  ;;  %v658_v22 = vand.u32 2139095040, %v2150_v18  ;;  %v549_v62 = vand.u32 65535, %v2162_v52 }
  0x8d   : > { %v512_v21 = vsel %vm511_vm0, %v510_v17, 0  ;;  %v550_v0 = vshrl.u32 %v2162_v52, 16 }
  0x8e   : > { %v514_v23 = vand.u32 31, %v512_v21  ;;  %v659_v24 = vshrl.u32 %v658_v22, 23  ;;  %v662_v25 = vand.u32 8388607, %v655_v20  ;;  %v2158_v27 = vshrl.u32 %v512_v21, 5 }
  0x90   : > { %v515_v28 = vsub.s32 32, %v514_v23  ;;  %v517_v30 = vshll.u32 %v2022_v29, %v514_v23  ;;  %v520_v32 = vshll.u32 %v2023_v31, %v514_v23  ;;  %v523_v34 = vshll.u32 %v2024_v33, %v514_v23 }
  0x91   : > { %v526_v36 = vshll.u32 %v2025_v35, %v514_v23  ;;  %v529_v42 = vshll.u32 %v2026_v40, %v514_v23  ;;  %v1813_v45 = vadd.s32 4294967169, %v659_v24  ;;  %v663_v46 = vor.u32 8388608, %v662_v25 }
  0x92   : > { %v518_v37 = vshrl.u32 %v2023_v31, %v515_v28  ;;  %v521_v38 = vshrl.u32 %v2024_v33, %v515_v28  ;;  %v524_v39 = vshrl.u32 %v2025_v35, %v515_v28  ;;  %v527_v41 = vshrl.u32 %v2026_v40, %v515_v28 }
  0x93   : > { %v530_v44 = vshrl.u32 %v2027_v43, %v515_v28  ;;  %vm535_vm1 = vcmp.lt.s32.totalorder %v2158_v27, 4  ;;  %v665_v53 = vadd.s32 1, %v1813_v45  ;;  %vm532_vm2 = vcmp.lt.s32.totalorder %v2158_v27, 1 }
  0x94   : > { %v519_v47 = vor.u32 %v518_v37, %v517_v30  ;;  %v522_v48 = vor.u32 %v521_v38, %v520_v32  ;;  %v525_v49 = vor.u32 %v524_v39, %v523_v34  ;;  %v528_v50 = vor.u32 %v527_v41, %v526_v36 }
  0x95   : > { %v531_v51 = vor.u32 %v530_v44, %v529_v42  ;;  %v2167_v55 = vshll.u32 %v663_v46, 8  ;;  %vm534_vm3 = vcmp.lt.s32.totalorder %v2158_v27, 3  ;;  %vm666_vm4 = vcmp.gt.s32.totalorder %v665_v53, 0 }
  0x96   : > { %v541_v54 = vsel %vm535_vm1, %v528_v50, 920167782  ;;  %v540_v56 = vsel %vm532_vm2, %v519_v47, %v522_v48  ;;  %v544_v59 = vsel %vm532_vm2, %v522_v48, %v525_v49  ;;  %v667_v61 = vsel %vm666_vm4, %v665_v53, 0 }
  0x97   : > { %v545_v57 = vsel %vm535_vm1, %v531_v51, 1326507024  ;;  %v542_v58 = vsel %vm534_vm3, %v525_v49, %v541_v54  ;;  %v669_v63 = vand.u32 31, %v667_v61  ;;  %v2183_v2 = vand.u32 65535, %v2167_v55 }
  0x98   : > { %v546_v60 = vsel %vm534_vm3, %v528_v50, %v545_v57  ;;  %v516_v4 = vshrl.u32 %v2022_v29, %v515_v28  ;;  %vm533_vm5 = vcmp.lt.s32.totalorder %v2158_v27, 2  ;;  %v2187_v5 = vshrl.u32 %v667_v61, 5 }
  0x99   : > { %v2189_v7 = vsub.s32 32, %v669_v63  ;;  %v543_v9 = vsel %vm533_vm5, %v540_v56, %v542_v58  ;;  %v547_v10 = vsel %vm533_vm5, %v544_v59, %v546_v60  ;;  %v672_v11 = vshll.u32 %v2022_v29, %v669_v63 }
  0x9a   : > { %v675_v12 = vshll.u32 %v2023_v31, %v669_v63  ;;  %v681_v15 = vshll.u32 %v2025_v35, %v669_v63  ;;  %v537_v16 = vsel %vm535_vm1, %v525_v49, 2102212464  ;;  %v678_v23 = vshll.u32 %v2024_v33, %v669_v63 }
  0x9b   : > { %v673_v17 = vshrl.u32 %v2023_v31, %v2189_v7  ;;  %v676_v19 = vshrl.u32 %v2024_v33, %v2189_v7  ;;  %v679_v21 = vshrl.u32 %v2025_v35, %v2189_v7  ;;  %v682_v22 = vshrl.u32 %v2026_v40, %v2189_v7 }
  0x9c   : > { %v685_v24 = vshrl.u32 %v2027_v43, %v2189_v7  ;;  %v551_v25 = vand.u32 65535, %v547_v10  ;;  %v574_v26 = vshrl.u32 %v543_v9, 16  ;;  %v684_v34 = vshll.u32 %v2026_v40, %v669_v63 }
  0x9d   : > { %v2203_v28 = vor.u32 %v673_v17, %v672_v11  ;;  %v2205_v30 = vor.u32 %v676_v19, %v675_v12  ;;  %v683_v32 = vor.u32 %v682_v22, %v681_v15  ;;  %v2207_v36 = vor.u32 %v679_v21, %v678_v23 }
  0x9e   : > { %v2210_v31 = vshrl.u32 %v2167_v55, 16  ;;  %v552_v37 = vshrl.u32 %v547_v10, 16  ;;  %v573_v35 = vand.u32 65535, %v543_v9  ;;  %v686_v38 = vor.u32 %v685_v24, %v684_v34 }
  0x9f   : > { %vm690_vm6 = vcmp.lt.s32.totalorder %v2187_v5, 4  ;;  %v536_v33 = vsel %vm532_vm2, %v516_v4, %v519_v47  ;;  %v538_v39 = vsel %vm534_vm3, %v522_v48, %v537_v16  ;;  %vm687_vm7 = vcmp.lt.s32.totalorder %v2187_v5, 1 }
  0xa0   : > { %v696_v40 = vsel %vm690_vm6, %v683_v32, 920167782  ;;  %v554_v41 = vmul.u32 %v552_v37, %v549_v62  ;;  %v555_v42 = vmul.u32 %v551_v25, %v550_v0  ;;  %vm689_vm8 = vcmp.lt.s32.totalorder %v2187_v5, 3 }
  0xa1   : > { %v695_v43 = vsel %vm687_vm7, %v2203_v28, %v2205_v30  ;;  %v553_v44 = vmul.u32 %v551_v25, %v549_v62  ;;  %v576_v45 = vmul.u32 %v574_v26, %v549_v62  ;;  %v699_v46 = vsel %vm687_vm7, %v2205_v30, %v2207_v36 }
  0xa2   : > { %v557_v47 = vshll.u32 %v554_v41, 16  ;;  %v575_v48 = vmul.u32 %v573_v35, %v549_v62  ;;  %v577_v49 = vmul.u32 %v573_v35, %v550_v0  ;;  %v697_v50 = vsel %vm689_vm8, %v2207_v36, %v696_v40 }
  0xa3   : > { %v700_v51 = vsel %vm690_vm6, %v686_v38, 1326507024  ;;  %v556_v53 = vmul.u32 %v552_v37, %v550_v0  ;;  %v579_v54 = vshll.u32 %v576_v45, 16  ;;  %v559_v56 = vshll.u32 %v555_v42, 16 }
  0xa4   : > { %vm561_vm9 = vc.u32 %v553_v44, %v557_v47  ;;  %v563_v57 = vadd.s32 %v557_v47, %v553_v44  ;;  %v578_v58 = vmul.u32 %v574_v26, %v550_v0  ;;  %v581_v60 = vshll.u32 %v577_v49, 16 }
  0xa5   : > { %v562_v59 = vsel %vm561_vm9, 1, %v2021_v1  ;;  %vm583_vm10 = vc.u32 %v575_v48, %v579_v54  ;;  %v585_v61 = vadd.s32 %v579_v54, %v575_v48  ;;  %v701_v62 = vsel %vm689_vm8, %v683_v32, %v700_v51 }
  0xa6   : > { %v564_v63 = vadd.s32 %v562_v59, %v556_v53  ;;  %vm565_vm11 = vc.u32 %v563_v57, %v559_v56  ;;  %v584_v4 = vsel %vm583_vm10, 1, %v2021_v1  ;;  %vm688_vm13 = vcmp.lt.s32.totalorder %v2187_v5, 2 }
  0xa7   : > { %v566_v9 = vsel %vm565_vm11, 1, %v2021_v1  ;;  %v586_v10 = vadd.s32 %v584_v4, %v578_v58  ;;  %vm587_vm12 = vc.u32 %v585_v61, %v581_v60  ;;  %v558_v11 = vshrl.u32 %v554_v41, 16 }
  0xa8   : > { %v568_v0 = vadd.s32 %v566_v9, %v564_v63  ;;  %v588_v12 = vsel %vm587_vm12, 1, %v2021_v1  ;;  %v698_v15 = vsel %vm688_vm13, %v695_v43, %v697_v50  ;;  %v539_v16 = vsel %vm533_vm5, %v536_v33, %v538_v39 }
  0xa9   : > { %v580_v17 = vshrl.u32 %v576_v45, 16  ;;  %v590_v19 = vadd.s32 %v588_v12, %v586_v10  ;;  %v702_v21 = vsel %vm688_vm13, %v699_v46, %v701_v62  ;;  %v560_v22 = vshrl.u32 %v555_v42, 16 }
  0xaa   : > { %v569_v23 = vadd.s32 %v568_v0, %v558_v11  ;;  %v706_v24 = vand.u32 65535, %v702_v21  ;;  %v707_v25 = vshrl.u32 %v702_v21, 16  ;;  %v582_v26 = vshrl.u32 %v577_v49, 16 }
  0xab   : > { %v591_v32 = vadd.s32 %v590_v19, %v580_v17  ;;  %v728_v34 = vand.u32 65535, %v698_v15  ;;  %v729_v37 = vshrl.u32 %v698_v15, 16  ;;  %v2249_v38 = vadd.s32 %v585_v61, %v581_v60 }
  0xac   : > { %v2247_v35 = vadd.s32 %v569_v23, %v560_v22  ;;  %v709_v27 = vmul.u32 %v707_v25, %v2183_v2  ;;  %v710_v33 = vmul.u32 %v706_v24, %v2210_v31  ;;  %v593_v41 = vmul.u32 %v2162_v52, %v539_v16 }
  0xad   : > { %v592_v39 = vadd.s32 %v591_v32, %v582_v26  ;;  %v731_v40 = vmul.u32 %v729_v37, %v2183_v2  ;;  %v708_v42 = vmul.u32 %v706_v24, %v2183_v2  ;;  %v730_v45 = vmul.u32 %v728_v34, %v2183_v2 }
  0xae   : > { %vm595_vm14 = vc.u32 %v2247_v35, %v2249_v38  ;;  %v712_v43 = vshll.u32 %v709_v27, 16  ;;  %v732_v46 = vmul.u32 %v728_v34, %v2210_v31  ;;  %v711_v48 = vmul.u32 %v707_v25, %v2210_v31 }
  0xaf   : > { %v596_v44 = vadd.s32 1, %v592_v39  ;;  %v734_v47 = vshll.u32 %v731_v40, 16  ;;  %v714_v49 = vshll.u32 %v710_v33, 16  ;;  %v733_v53 = vmul.u32 %v729_v37, %v2210_v31 }
  0xb0   : > { %vm716_vm15 = vc.u32 %v708_v42, %v712_v43  ;;  %v718_v50 = vadd.s32 %v712_v43, %v708_v42  ;;  %v736_v58 = vshll.u32 %v732_v46, 16  ;;  %v713_v62 = vshrl.u32 %v709_v27, 16 }
  0xb1   : > { %v597_v51 = vsel %vm595_vm14, %v596_v44, %v592_v39  ;;  %v717_v52 = vsel %vm716_vm15, 1, %v2021_v1  ;;  %vm738_vm0 = vc.u32 %v730_v45, %v734_v47  ;;  %v740_v59 = vadd.s32 %v734_v47, %v730_v45 }
  0xb2   : > { %v598_v54 = vadd.s32 %v597_v51, %v593_v41  ;;  %v719_v56 = vadd.s32 %v717_v52, %v711_v48  ;;  %vm720_vm1 = vc.u32 %v718_v50, %v714_v49  ;;  %v739_v57 = vsel %vm738_vm0, 1, %v2021_v1 }
  0xb3   : > { %v721_v2 = vsel %vm720_vm1, 1, %v2021_v1  ;;  %v741_v60 = vadd.s32 %v739_v57, %v733_v53  ;;  %v671_v4 = vshrl.u32 %v2022_v29, %v2189_v7  ;;  %v692_v31 = vsel %vm690_vm6, %v2207_v36, 2102212464 }
  0xb4   : > { %v599_v61 = vadd.s32 536870912, %v598_v54  ;;  %v723_v63 = vadd.s32 %v721_v2, %v719_v56  ;;  %vm742_vm2 = vc.u32 %v740_v59, %v736_v58  ;;  %v715_v10 = vshrl.u32 %v710_v33, 16 }
  0xb5   : > { %v743_v0 = vsel %vm742_vm2, 1, %v2021_v1  ;;  %v735_v12 = vshrl.u32 %v731_v40, 16  ;;  %v691_v17 = vsel %vm687_vm7, %v671_v4, %v2203_v28  ;;  %v693_v29 = vsel %vm689_vm8, %v2205_v30, %v692_v31 }
  0xb6   : > { %v2270_v9 = vshrl.u32 %v599_v61, 30  ;;  %v724_v11 = vadd.s32 %v723_v63, %v713_v62  ;;  %v745_v15 = vadd.s32 %v743_v0, %v741_v60  ;;  %v737_v36 = vshrl.u32 %v732_v46, 16 }
  0xb7   : > { %v744_v22 = vadd.s32 %v740_v59, %v736_v58  ;;  %v694_v1 = vsel %vm688_vm13, %v691_v17, %v693_v29  ;;  %v594_v5 = vadd.s32 %v2249_v38, %v2247_v35  ;;  %vm502_vm8 = vcmp.lt.s32.totalorder %v2141_v8, 0 }
  0xb8   : > { %v601_v16 = vshll.u32 %v2270_v9, 30  ;;  %v725_v7 = vadd.s32 %v724_v11, %v715_v10  ;;  %v746_v19 = vadd.s32 %v745_v15, %v735_v12  ;;  %v748_v28 = vmul.u32 %v2167_v55, %v694_v1 }
  0xb9   : > { %vm2291_vm9 = vcmp.le.f32.partialorder %v500_v14, 0.7853982  ;;  %vm657_vm10 = vcmp.lt.s32.totalorder %v2150_v18, 0  ;;  %vm2304_vm11 = vcmp.le.f32.partialorder %v655_v20, 0.7853982  ;;  %vm643_vm2 = vweird.f32 %v2141_v8 }
  0xba   : > { %v602_v21 = vsub.s32 %v598_v54, %v601_v16  ;;  %v747_v23 = vadd.s32 %v746_v19, %v737_v36  ;;  %vm750_vm4 = vc.u32 %v725_v7, %v744_v22  ;;  %v749_v58 = vadd.s32 %v744_v22, %v725_v7 }
  0xbc   : > { %vm603_vm3 = vcmp.lt.s32.totalorder %v602_v21, 0  ;;  %v604_v24 = vsub.s32 0, %v602_v21  ;;  %v751_v25 = vadd.s32 1, %v747_v23 }
  0xbe   : > { %v605_v26 = vsel %vm603_vm3, %v604_v24, %v602_v21  ;;  %v752_v34 = vsel %vm750_vm4, %v751_v25, %v747_v23  ;;  %vm798_vm3 = vweird.f32 %v2150_v18  ;;  %vm827_vm4 = vcmask 261120  }
  0xbf   : > { %v606_v32 = vclz %v605_v26  ;;  %v753_v37 = vadd.s32 %v752_v34, %v748_v28 }
  0xc1   : > { %v1811_v30 = vadd.s32 4294967294, %v606_v32  ;;  %v754_v27 = vadd.s32 536870912, %v753_v37 }
  0xc3   : > { %vm1812_vm5 = vcmp.lt.s32.totalorder %v1811_v30, 0  ;;  %v2283_v39 = vshrl.u32 %v754_v27, 30 }
  0xc4   : > { %v609_v33 = vsel %vm1812_vm5, 0, %v1811_v30 }
  0xc5   : > { %v610_v40 = vsub.s32 32, %v609_v33  ;;  %v614_v41 = vsub.s32 4294967266, %v609_v33  ;;  %v756_v42 = vshll.u32 %v2283_v39, 30  ;;  %v611_v43 = vshll.u32 %v602_v21, %v609_v33 }
  0xc6   : > { %v624_v21 = vsub.s32 4, %v2270_v9  ;;  %v779_v28 = vsub.s32 4, %v2283_v39 }
  0xc7   : > { %v612_v44 = vshrl.u32 %v594_v5, %v610_v40  ;;  %v615_v45 = vadd.s32 127, %v614_v41  ;;  %v757_v55 = vsub.s32 %v753_v37, %v756_v42 }
  0xc8   : > { %v625_v26 = vsel %vm502_vm8, %v624_v21, %v2270_v9  ;;  %v780_v5 = vsel %vm657_vm10, %v779_v28, %v2283_v39 }
  0xc9   : > { %v613_v46 = vor.u32 %v612_v44, %v611_v43  ;;  %v616_v47 = vshll.u32 %v615_v45, 23  ;;  %vm758_vm6 = vcmp.lt.s32.totalorder %v757_v55, 0  ;;  %v759_v48 = vsub.s32 0, %v757_v55 }
  0xca   : > { %v627_v30 = vsel %vm2291_vm9, 0, %v625_v26  ;;  %v782_v44 = vsel %vm2304_vm11, 0, %v780_v5 }
  0xcb   : > { %v617_v49 = vor.u32 4788187, %v616_v47  ;;  %v760_v50 = vsel %vm758_vm6, %v759_v48, %v757_v55  ;;  %v620_v52 = vcvt.s32.f32 %v613_v46  ;;  %v644_v9 = vadd.s32 3, %v627_v30 }
  0xcc   : > { %v761_v53 = vclz %v760_v50  ;;  %v799_v50 = vadd.s32 3, %v782_v44  ;;  %vm463_vm6 = vcmask 1043456   ;;  %v1930_v44 = vld [vmem:[%s2138_s15 + $0x28] sm:$0xff] }
  0xcd   : > { %v618_v51 = vand.u32 2147483647, %v617_v49  ;;  %v645_v49 = vand.u32 3, %v644_v9  ;;  %967 = vmatpush.bf16.msra.mxu3 %v1930_v44 }
  0xce   : > { %v1814_v56 = vadd.s32 4294967294, %v761_v53 }
  0xcf   : > { %v621_v54 = vmul.f32 %v620_v52, %v618_v51  ;;  %vm647_vm12 = vcmp.eq.s32.totalorder %v645_v49, 0  ;;  %vm650_vm13 = vcmp.eq.s32.totalorder %v645_v49, 2  ;;  %vm646_vm14 = vcmp.lt.s32.totalorder %v645_v49, 2  ;;  %v1931_v49 = vld [vmem:[%s2138_s15 + $0x30] sm:$0xff] }
  0xd0   : > { %vm1815_vm7 = vcmp.lt.s32.totalorder %v1814_v56, 0 }
  0xd1   : > { %v622_v35 = vxor.u32 2147483648, %v621_v54  ;;  %v764_v57 = vsel %vm1815_vm7, 0, %v1814_v56  ;;  %vm459_vm7 = vcmask 64512  }
  0xd2   : > { %v765_v59 = vsub.s32 32, %v764_v57  ;;  %v769_v60 = vsub.s32 4294967266, %v764_v57  ;;  %v766_v63 = vshll.u32 %v757_v55, %v764_v57 }
  0xd3   : > { %v623_v2 = vsel %vm502_vm8, %v622_v35, %v621_v54  ;;  %v800_v35 = vand.u32 3, %v799_v50 }
  0xd4   : > { %v626_v61 = vsel %vm2291_vm9, %v2141_v8, %v623_v2  ;;  %v767_v4 = vshrl.u32 %v749_v58, %v765_v59  ;;  %v770_v31 = vadd.s32 127, %v769_v60 }
  0xd5   : > { %v628_v62 = vmul.f32 %v626_v61, %v626_v61  ;;  %vm802_vm15 = vcmp.eq.s32.totalorder %v800_v35, 0  ;;  %vm805_vm0 = vcmp.eq.s32.totalorder %v800_v35, 2  ;;  %vm801_vm1 = vcmp.lt.s32.totalorder %v800_v35, 2 }
  0xd6   : > { %v768_v11 = vor.u32 %v767_v4, %v766_v63  ;;  %v771_v0 = vshll.u32 %v770_v31, 23 }
  0xd7   : > { %v629_v10 = vmul.f32 -0.001358992, %v628_v62  ;;  %v636_v14 = vmul.f32 -0.00019511016, %v628_v62 }
  0xd8   : > { %v772_v15 = vor.u32 4788187, %v771_v0  ;;  %v775_v7 = vcvt.s32.f32 %v768_v11  ;;  %v847_v0 = vperm.slane %v2128_v3, 3 }
  0xd9   : > { %v637_v12 = vadd.f32 0.008332121, %v636_v14  ;;  %v630_v16 = vadd.f32 0.041655596, %v629_v10  ;;  %v497_v14 = vperm.slane %v2128_v3, 2 }
  0xda   : > { %v773_v29 = vand.u32 2147483647, %v772_v15 }
  0xdb   : > { %v638_v17 = vmul.f32 %v637_v12, %v628_v62  ;;  %v631_v22 = vmul.f32 %v630_v16, %v628_v62  ;;  %v498_v11 = vmul.f32 %v497_v14, %v2133_v6  ;;  %v2028_v6 = vmov 32.0  }
  0xdc   : > { %v776_v19 = vmul.f32 %v775_v7, %v773_v29  ;;  %1962 = vrcp.f32 %v2028_v6  ;;  %v2370_v6 = vld [vmem:[%s2125_s30 + $0x8] sm:$0xff] }
  0xdd   : > { %v639_v36 = vadd.f32 -0.16666654, %v638_v17  ;;  %v632_v34 = vadd.f32 -0.4999988, %v631_v22 }
  0xde   : > { %v777_v1 = vxor.u32 2147483648, %v776_v19 }
  0xdf   : > { %v640_v23 = vmul.f32 %v639_v36, %v628_v62  ;;  %v633_v40 = vmul.f32 %v632_v34, %v628_v62 }
  0xe0   : > { %v778_v25 = vsel %vm657_vm10, %v777_v1, %v776_v19 }
  0xe1   : > { %v781_v32 = vsel %vm2304_vm11, %v2150_v18, %v778_v25  ;;  %v641_v20 = vadd.f32 1.0, %v640_v23  ;;  %v634_v46 = vadd.f32 1.0, %v633_v40  ;;  %v499_v18 = vmul.f32 %v497_v14, %v2146_v13 }
  0xe2   : > { %v783_v37 = vmul.f32 %v781_v32, %v781_v32  ;;  %v1963_v19 = vpop.eup %1962 }
  0xe3   : > { %v642_v43 = vmul.f32 %v641_v20, %v626_v61  ;;  %v651_v54 = vxor.u32 2147483648, %v634_v46  ;;  %v857_v21 = vmul.f32 32.0, %v1963_v19  ;;  %vm861_vm5 = vweird.f32 %v1963_v19 }
  0xe4   : > { %v784_v27 = vmul.f32 -0.001358992, %v783_v37  ;;  %v791_v33 = vmul.f32 -0.00019511016, %v783_v37 }
  0xe5   : > { %v648_v51 = vxor.u32 2147483648, %v642_v43  ;;  %v652_v58 = vsel %vm650_vm13, %v651_v54, %v642_v43  ;;  %v858_v22 = vsub.f32 1.0, %v857_v21  ;;  %v1928_v43 = vld [vmem:[%s2138_s15 + $0x18] sm:$0xff] }
  0xe6   : > { %v785_v41 = vadd.f32 0.041655596, %v784_v27  ;;  %v792_v42 = vadd.f32 0.008332121, %v791_v33  ;;  %v452_v33 = vld [vmem:[%s2347_s20] sm:$0xff]  ;;  %935 = vmatpush.bf16.msra.mxu2 %v1928_v43 }
  0xe7   : > { %v649_v38 = vsel %vm647_vm12, %v634_v46, %v648_v51  ;;  %v859_v1 = vmul.f32 %v1963_v19, %v858_v22  ;;  %v457_v5 = vpack.c.bf16 %v452_v33, %v452_v33  ;;  %v1961_v43 = vld [vmem:[%s2347_s20 + $0x8] ss:$0 sm:$0xff] }
  0xe8   : > { %v786_v45 = vmul.f32 %v785_v41, %v783_v37  ;;  %v793_v55 = vmul.f32 %v792_v42, %v783_v37  ;;  %v653_v60 = vsel %vm646_vm14, %v649_v38, %v652_v58  ;;  %v454_v41 = vld [vmem:[%s2555_s2] sm:$0xff]  ;;  %v455_v42 = vld [vmem:[%s2555_s2 + $0x8] sm:$0xff]  ;;  %vm1029_vm14 = vcmask 130048  }
  0xe9   : > { %v654_v4 = vsel %vm643_vm2, nan, %v653_v60  ;;  %v860_v23 = vadd.f32 %v1963_v19, %v859_v1  ;;  %v465_v40 = vsel %vm463_vm6, %v457_v5, 0  ;;  %v456_v9 = vpack.c.bf16 %v455_v42, %v454_v41 }
  0xea   : > { %v787_v47 = vadd.f32 -0.4999988, %v786_v45  ;;  %v794_v48 = vadd.f32 -0.16666654, %v793_v55  ;;  %474 = vmatpush.bf16.msra.mxu0 %v465_v40  ;;  %v1932_v45 = vld [vmem:[%s2138_s15 + $0x38] sm:$0xff] }
  0xeb   : > { %v2335_v24 = vsel %vm861_vm5, %v1963_v19, %v860_v23  ;;  %v980_v19 = vperm.slane %v2370_v6, 2 }
  0xec   : > { %v788_v52 = vmul.f32 %v787_v47, %v783_v37  ;;  %v795_v53 = vmul.f32 %v794_v48, %v783_v37  ;;  %v1927_v47 = vld [vmem:[%s2138_s15 + $0x10] sm:$0xff]  ;;  %v1929_v48 = vld [vmem:[%s2138_s15 + $0x20] sm:$0xff] }
  0xed   : > { %1809 = vmatmul.msk.bf16.vlgmr.msra.gmra.mxu0 %vm459_vm7, %v456_v9  ;;  %936 = vmatpush.bf16.msra.mxu2 %v1927_v47 }
  0xee   : > { %v789_v39 = vadd.f32 1.0, %v788_v52  ;;  %v796_v56 = vadd.f32 1.0, %v795_v53  ;;  %999 = vmatpush.bf16.msrb.mxu0 %v1932_v45  ;;  %968 = vmatpush.bf16.msra.mxu3 %v1929_v48 }
  0xf0   : > { %v797_v57 = vmul.f32 %v796_v56, %v781_v32  ;;  %v806_v2 = vxor.u32 2147483648, %v789_v39 }
  0xf2   : > { %v803_v59 = vxor.u32 2147483648, %v797_v57  ;;  %v807_v62 = vsel %vm805_vm0, %v806_v2, %v797_v57  ;;  %1000 = vmatpush.bf16.msrb.mxu0 %v1931_v49 }
  0xf4   : > { %v804_v61 = vsel %vm802_vm15, %v789_v39, %v803_v59 }
  0xf5   : > { %v808_v63 = vsel %vm801_vm1, %v804_v61, %v807_v62 }
  0xf6   : > { %v809_v31 = vsel %vm798_vm3, nan, %v808_v63 }
  0xf7   : > { %v814_v10 = vpack.c.bf16 %v809_v31, %v654_v4  ;;  %v901_v4 = vperm.slane %v2128_v3, 4 }
  0xf9   : > { %1824 = vmatmul.msk.bf16.vlgmr.msra.gmra.mxu1 %vm827_vm4, %v814_v10 }
 0x176   : > { %v840_v12 = vpop.f32.mrf.mxu1 }
 0x177   : > { %v845_v15 = vadd.f32 %v840_v12, %v498_v11 }
 0x179   : > { %v2326_v16 = vadd.f32 %v847_v0, %v845_v15 }
 0x17b   : > { %v850_v8 = vsel %vm827_vm4, %v2326_v16, 0.0 }
 0x17c   : > { %851 = vadd.xlane.f32.xlu1 %v850_v8 }
 0x17e   : > { %v842_v17 = vpop.f32.mrf.mxu1 }
 0x17f   : > { %v846_v29 = vadd.f32 %v842_v17, %v499_v18  ;;  %v476_v17 = vpop.f32.mrf.mxu0 }
 0x180   : > { %v2380_v44 = vadd.f32 %v1961_v43, %v476_v17 }
 0x181   : > { %v2331_v7 = vadd.f32 %v847_v0, %v846_v29  ;;  %v904_v0 = vperm.slane %v2128_v3, 5 }
 0x183   : > { %v853_v36 = vsel %vm827_vm4, %v2331_v7, 0.0 }
 0x184   : > { %854 = vadd.xlane.f32.xlu1 %v853_v36 }
 0x187   : > { %v478_v29 = vpop.f32.mrf.mxu0 }
 0x188   : > { %v2382_v45 = vadd.f32 %v1961_v43, %v478_v29 }
 0x18a   : > { %v1316_v47 = vpack.c.bf16 %v2382_v45, %v2380_v44 }
 0x1ef   : > { %v852_v13 = vpop.xlane.xlu1 %851 }
 0x1f0   : > { %v863_v25 = vmul.f32 %v2335_v24, %v852_v13  ;;  %v948_v13 = vperm.slane %v2370_v6, 1 }
 0x1f2   : > { %v865_v26 = vsub.f32 %v2326_v16, %v863_v25 }
 0x1f4   : > { %v867_v28 = vmul.f32 %v865_v26, %v865_v26 }
 0x1f6   : > { %v869_v32 = vsel %vm827_vm4, %v867_v28, 0.0 }
 0x1f7   : > { %870 = vadd.xlane.f32.xlu2 %v869_v32  ;;  %v855_v34 = vpop.xlane.xlu1 %854 }
 0x1f8   : > { %v864_v37 = vmul.f32 %v2335_v24, %v855_v34 }
 0x1fa   : > { %v866_v30 = vsub.f32 %v2331_v7, %v864_v37 }
 0x1fc   : > { %v868_v20 = vmul.f32 %v866_v30, %v866_v30 }
 0x1fe   : > { %v872_v27 = vsel %vm827_vm4, %v868_v20, 0.0 }
 0x1ff   : > { %873 = vadd.xlane.f32.xlu2 %v872_v27 }
 0x26a   : > { %v871_v55 = vpop.xlane.xlu2 %870 }
 0x26b   : > { %v875_v46 = vmul.f32 %v871_v55, %v2335_v24  ;;  %v1936_v55 = vld [vmem:[%s2138_s15 + $0x58] sm:$0xff] }
 0x26c   : > { %1189 = vmatpush.bf16.msra.mxu0 %v1936_v55 }
 0x26d   : > { %v877_v50 = vadd.f32 1e-05, %v875_v46  ;;  %v1935_v46 = vld [vmem:[%s2138_s15 + $0x50] sm:$0xff] }
 0x26f   : > { %1964 = vrsqrt.f32 %v877_v50  ;;  %vm885_vm9 = vweird.f32 %v877_v50 }
 0x270   : > { %1190 = vmatpush.bf16.msra.mxu0 %v1935_v46 }
 0x272   : > { %v874_v51 = vpop.xlane.xlu2 %873 }
 0x273   : > { %v876_v52 = vmul.f32 %v874_v51, %v2335_v24 }
 0x275   : > { %v1965_v53 = vpop.eup %1964  ;;  %v878_v54 = vadd.f32 1e-05, %v876_v52 }
 0x276   : > { %v880_v39 = vmul.f32 %v1965_v53, %v877_v50  ;;  %vm886_vm8 = vweird.f32 %v1965_v53 }
 0x277   : > { %1966 = vrsqrt.f32 %v878_v54  ;;  %vm887_vm10 = vmor %vm885_vm9, %vm886_vm8  ;;  %vm895_vm12 = vweird.f32 %v878_v54 }
 0x278   : > { %v881_v56 = vmul.f32 %v1965_v53, %v880_v39 }
 0x27a   : > { %v882_v35 = vmul.f32 0.5, %v881_v56 }
 0x27c   : > { %v883_v38 = vsub.f32 1.5, %v882_v35 }
 0x27d   : > { %v1967_v57 = vpop.eup %1966 }
 0x27e   : > { %v884_v2 = vmul.f32 %v1965_v53, %v883_v38  ;;  %v890_v58 = vmul.f32 %v1967_v57, %v878_v54  ;;  %vm896_vm11 = vweird.f32 %v1967_v57 }
 0x27f   : > { %vm897_vm13 = vmor %vm895_vm12, %vm896_vm11 }
 0x280   : > { %v891_v59 = vmul.f32 %v1967_v57, %v890_v58  ;;  %v888_v60 = vsel %vm887_vm10, %v1965_v53, %v884_v2 }
 0x281   : > { %v899_v63 = vmul.f32 %v888_v60, %v865_v26 }
 0x282   : > { %v892_v61 = vmul.f32 0.5, %v891_v59 }
 0x283   : > { %v902_v11 = vmul.f32 %v901_v4, %v899_v63  ;;  %v1933_v63 = vld [vmem:[%s2138_s15 + $0x40] sm:$0xff] }
 0x284   : > { %v893_v62 = vsub.f32 1.5, %v892_v61 }
 0x285   : > { %v905_v15 = vadd.f32 %v904_v0, %v902_v11 }
 0x286   : > { %v894_v31 = vmul.f32 %v1967_v57, %v893_v62  ;;  %v1934_v62 = vld [vmem:[%s2138_s15 + $0x48] sm:$0xff] }
 0x287   : > { %1098 = vmatpush.bf16.msrb.mxu3 %v1934_v62 }
 0x288   : > { %v898_v10 = vsel %vm897_vm13, %v1967_v57, %v894_v31 }
 0x289   : > { %v900_v14 = vmul.f32 %v898_v10, %v866_v30  ;;  %v913_v30 = vperm.slane %v2370_v6, 0 }
 0x28b   : > { %v903_v12 = vmul.f32 %v901_v4, %v900_v14  ;;  %1099 = vmatpush.bf16.msrb.mxu3 %v1933_v63  ;;  %v1108_v14 = vperm.slane %v2370_v6, 3 }
 0x28d   : > { %v906_v8 = vadd.f32 %v904_v0, %v903_v12 }
 0x28f   : > { %v912_v18 = vpack.c.bf16 %v906_v8, %v905_v15 }
 0x291   : > { %1837 = vmatmul.msk.bf16.vlgmr.msra.gmra.mxu2 %vm827_vm4, %v912_v18  ;;  %1850 = vmatmul.msk.bf16.vlgmr.msra.gmra.mxu3 %vm827_vm4, %v912_v18 }
 0x292   : > { %1863 = vmatmul.msk.bf16.vlgmr.msrb.gmra.mxu0 %vm827_vm4, %v912_v18 }
 0x293   : > { %1327 = vmatpush.bf16.msrb.mxu0 %v1316_v47  ;;  %v1992_v47 = vld [vmem:[%s2125_s30] sm:$0xff] }
 0x30f   : > { %v1002_v36 = vpop.f32.mrf.mxu0 }
 0x310   : > { %v1003_v1 = vadd.f32 %v1002_v36, %v980_v19 }
 0x314   : > { %v970_v21 = vpop.f32.mrf.mxu3  ;;  %v938_v22 = vpop.f32.mrf.mxu2 }
 0x315   : > { %v971_v28 = vadd.f32 %v970_v21, %v948_v13  ;;  %v939_v33 = vadd.f32 %v938_v22, %v913_v30 }
 0x317   : > { %v1004_v3 = vpop.f32.mrf.mxu0 }
 0x318   : > { %v1005_v23 = vadd.f32 %v1004_v3, %v980_v19 }
 0x31a   : > { %v1053_v25 = vpack.c.bf16 %v1005_v23, %v1003_v1 }
 0x31c   : > { %1064 = vmatpush.bf16.msrb.mxu2 %v1053_v25  ;;  %v972_v26 = vpop.f32.mrf.mxu3  ;;  %v940_v37 = vpop.f32.mrf.mxu2 }
 0x31d   : > { %v973_v32 = vadd.f32 %v972_v26, %v948_v13  ;;  %v941_v27 = vadd.f32 %v940_v37, %v913_v30 }
 0x31f   : > { %v1008_v34 = vpack.c.bf16 %v973_v32, %v971_v28  ;;  %v1007_v5 = vpack.c.bf16 %v941_v27, %v939_v33 }
 0x321   : > { %v1013_v20 = vsel %vm827_vm4, %v1008_v34, 0 }
 0x322   : > { %1022 = vmatpush.bf16.xpose.msrb.mxu1 %v1013_v20 }
 0x329   : > { %1864 = vmatmul.msk.bf16.vlgmr.msrb.gmra.mxu1 %vm827_vm4, %v1007_v5 }
 0x3a6   : > { %v1024_v40 = vpop.f32.mrf.mxu1 }
 0x3a7   : > { %v1030_v41 = vsel %vm1029_vm14, %v1024_v40, -inf }
 0x3a8   : > { %1031 = vmax.xlane.f32.xlu0 %v1030_v41 }
 0x3ae   : > { %v1026_v42 = vpop.f32.mrf.mxu1 }
 0x3af   : > { %v1033_v9 = vsel %vm1029_vm14, %v1026_v42, -inf }
 0x3b0   : > { %1034 = vmax.xlane.f32.xlu1 %v1033_v9 }
 0x41b   : > { %v1032_v48 = vpop.xlane.xlu0 %1031 }
 0x41c   : > { %v1036_v49 = vsub.f32 %v1024_v40, %v1032_v48  ;;  %v1155_v48 = vperm.slane %v1992_v47, 6 }
 0x41e   : > { %v1038_v50 = vmul.f32 1.442695, %v1036_v49 }
 0x420   : > { %1968 = vpow2.f32 %v1038_v50 }
 0x423   : > { %v1035_v51 = vpop.xlane.xlu1 %1034 }
 0x424   : > { %v1037_v52 = vsub.f32 %v1026_v42, %v1035_v51 }
 0x426   : > { %v1969_v53 = vpop.eup %1968  ;;  %v1040_v54 = vmul.f32 1.442695, %v1037_v52  ;;  %v1158_v52 = vperm.slane %v1992_v47, 7 }
 0x427   : > { %v1042_v39 = vsel %vm1029_vm14, %v1969_v53, 0.0 }
 0x428   : > { %1970 = vpow2.f32 %v1040_v54  ;;  %1043 = vadd.xlane.f32.xlu2 %v1042_v39 }
 0x42e   : > { %v1971_v56 = vpop.eup %1970 }
 0x42f   : > { %v1045_v35 = vsel %vm1029_vm14, %v1971_v56, 0.0 }
 0x430   : > { %1046 = vadd.xlane.f32.xlu1 %v1045_v35 }
 0x49b   : > { %v1044_v38 = vpop.xlane.xlu2 %1043 }
 0x49c   : > { %1972 = vrcp.f32 %v1044_v38 }
 0x4a2   : > { %v1973_v2 = vpop.eup %1972 }
 0x4a3   : > { %v1047_v57 = vpop.xlane.xlu1 %1046  ;;  %v1050_v59 = vmul.f32 %v1973_v2, %v1969_v53  ;;  %v1167_v2 = vperm.slane %v2370_v6, 4 }
 0x4a4   : > { %1974 = vrcp.f32 %v1047_v57  ;;  %v1938_v57 = vld [vmem:[%s2138_s15 + $0x68] sm:$0xff] }
 0x4a5   : > { %1243 = vmatpush.bf16.msra.mxu1 %v1938_v57 }
 0x4aa   : > { %v1975_v58 = vpop.eup %1974 }
 0x4ab   : > { %v1051_v60 = vmul.f32 %v1975_v58, %v1971_v56  ;;  %v1937_v58 = vld [vmem:[%s2138_s15 + $0x60] sm:$0xff]  ;;  %s441_s15 = scalar_lea.vmem %s2559_s6, %s1941_s12 }
 0x4ac   : > { %1244 = vmatpush.bf16.msra.mxu1 %v1937_v58 }
 0x4ad   : > { %v1052_v61 = vpack.c.bf16 %v1051_v60, %v1050_v59 }
 0x4af   : > { %1865 = vmatmul.msk.bf16.vlgmr.msrb.gmra.mxu2 %vm1029_vm14, %v1052_v61 }
 0x532   : > { %v1066_v4 = vpop.f32.mrf.mxu2 }
 0x53a   : > { %v1068_v31 = vpop.f32.mrf.mxu2 }
 0x53b   : > { %v1076_v10 = vpack.c.bf16 %v1068_v31, %v1066_v4 }
 0x53d   : > { %1878 = vmatmul.msk.bf16.vlgmr.msrb.gmra.mxu3 %vm827_vm4, %v1076_v10 }
 0x5c0   : > { %v1101_v11 = vpop.f32.mrf.mxu3 }
 0x5c1   : > { %v1106_v0 = vadd.f32 %v1101_v11, %v2326_v16 }
 0x5c3   : > { %v2396_v12 = vadd.f32 %v1108_v14, %v1106_v0 }
 0x5c5   : > { %v1111_v15 = vsel %vm827_vm4, %v2396_v12, 0.0 }
 0x5c6   : > { %1112 = vadd.xlane.f32.xlu2 %v1111_v15 }
 0x5c8   : > { %v1103_v8 = vpop.f32.mrf.mxu3 }
 0x5c9   : > { %v1107_v18 = vadd.f32 %v1103_v8, %v2331_v7 }
 0x5cb   : > { %v2401_v17 = vadd.f32 %v1108_v14, %v1107_v18 }
 0x5cd   : > { %v1114_v29 = vsel %vm827_vm4, %v2401_v17, 0.0 }
 0x5ce   : > { %1115 = vadd.xlane.f32.xlu1 %v1114_v29 }
 0x639   : > { %v1113_v36 = vpop.xlane.xlu2 %1112 }
 0x63a   : > { %v1117_v19 = vmul.f32 %v1113_v36, %v2335_v24 }
 0x63c   : > { %v1119_v16 = vsub.f32 %v2396_v12, %v1117_v19 }
 0x63e   : > { %v1121_v21 = vmul.f32 %v1119_v16, %v1119_v16 }
 0x640   : > { %v1123_v22 = vsel %vm827_vm4, %v1121_v21, 0.0 }
 0x641   : > { %1124 = vadd.xlane.f32.xlu2 %v1123_v22  ;;  %v1116_v3 = vpop.xlane.xlu1 %1115 }
 0x642   : > { %v1118_v1 = vmul.f32 %v1116_v3, %v2335_v24 }
 0x644   : > { %v1120_v7 = vsub.f32 %v2401_v17, %v1118_v1 }
 0x646   : > { %v1122_v23 = vmul.f32 %v1120_v7, %v1120_v7 }
 0x648   : > { %v1126_v13 = vsel %vm827_vm4, %v1122_v23, 0.0 }
 0x649   : > { %1127 = vadd.xlane.f32.xlu1 %v1126_v13  ;;  %v1221_v13 = vperm.slane %v2370_v6, 5 }
 0x659   : > { %1257 = vperm.xlu2 %1960, %v2370_v6  }
 0x6b4   : > { %v1125_v25 = vpop.xlane.xlu2 %1124 }
 0x6b5   : > { %v1129_v26 = vmul.f32 %v1125_v25, %v2335_v24 }
 0x6b7   : > { %v1131_v28 = vadd.f32 1e-05, %v1129_v26 }
 0x6b9   : > { %1976 = vrsqrt.f32 %v1131_v28  ;;  %vm1139_vm0 = vweird.f32 %v1131_v28 }
 0x6bc   : > { %v1128_v32 = vpop.xlane.xlu1 %1127 }
 0x6bd   : > { %v1130_v34 = vmul.f32 %v1128_v32, %v2335_v24 }
 0x6bf   : > { %v1977_v37 = vpop.eup %1976  ;;  %v1132_v30 = vadd.f32 1e-05, %v1130_v34 }
 0x6c0   : > { %v1134_v20 = vmul.f32 %v1977_v37, %v1131_v28  ;;  %vm1140_vm15 = vweird.f32 %v1977_v37 }
 0x6c1   : > { %1978 = vrsqrt.f32 %v1132_v30  ;;  %vm1141_vm1 = vmor %vm1139_vm0, %vm1140_vm15  ;;  %vm1149_vm3 = vweird.f32 %v1132_v30 }
 0x6c2   : > { %v1135_v27 = vmul.f32 %v1977_v37, %v1134_v20  ;;  %v1253_v20 = vpack.c.bf16 %v2370_v6, %v2370_v6 }
 0x6c4   : > { %v1136_v33 = vmul.f32 0.5, %v1135_v27  ;;  %v1260_v27 = vrot.slane %v1253_v20, 3 }
 0x6c6   : > { %v1137_v5 = vsub.f32 1.5, %v1136_v33  ;;  %v1939_v33 = vld [vmem:[%s2554_s1] sm:$0xff] }
 0x6c7   : > { %v1979_v40 = vpop.eup %1978 }
 0x6c8   : > { %v1138_v41 = vmul.f32 %v1977_v37, %v1137_v5  ;;  %v1144_v42 = vmul.f32 %v1979_v40, %v1132_v30  ;;  %vm1150_vm2 = vweird.f32 %v1979_v40  ;;  %v1299_v5 = vsel %vm1029_vm14, %v1939_v33, 0 }
 0x6c9   : > { %vm1151_vm5 = vmor %vm1149_vm3, %vm1150_vm2  ;;  %1308 = vmatpush.bf16.xpose.msra.mxu3 %v1299_v5 }
 0x6ca   : > { %v1145_v9 = vmul.f32 %v1979_v40, %v1144_v42  ;;  %v1142_v43 = vsel %vm1141_vm1, %v1977_v37, %v1138_v41 }
 0x6cb   : > { %v1153_v49 = vmul.f32 %v1142_v43, %v1119_v16 }
 0x6cc   : > { %v1146_v55 = vmul.f32 0.5, %v1145_v9 }
 0x6cd   : > { %v1156_v53 = vmul.f32 %v1155_v48, %v1153_v49 }
 0x6ce   : > { %v1147_v46 = vsub.f32 1.5, %v1146_v55 }
 0x6cf   : > { %v1159_v56 = vadd.f32 %v1158_v52, %v1156_v53  ;;  %v1339_v53 = vld [vmem:[%s441_s15 + $0x18] sm:$0xff] }
 0x6d0   : > { %v1148_v50 = vmul.f32 %v1979_v40, %v1147_v46 }
 0x6d2   : > { %v1152_v51 = vsel %vm1151_vm5, %v1979_v40, %v1148_v50 }
 0x6d3   : > { %v1154_v54 = vmul.f32 %v1152_v51, %v1120_v7 }
 0x6d5   : > { %v1157_v39 = vmul.f32 %v1155_v48, %v1154_v54 }
 0x6d7   : > { %v1160_v35 = vadd.f32 %v1158_v52, %v1157_v39  ;;  %v1338_v52 = vld [vmem:[%s441_s15 + $0x10] sm:$0xff]  ;;  %v1336_v39 = vld [vmem:[%s441_s15] sm:$0xff] }
 0x6d8   : > { %v1343_v54 = vpack.c.bf16 %v1339_v53, %v1338_v52 }
 0x6d9   : > { %v1166_v38 = vpack.c.bf16 %v1160_v35, %v1159_v56  ;;  %v1337_v56 = vld [vmem:[%s441_s15 + $0x8] sm:$0xff] }
 0x6da   : > { %1354 = vmatpush.bf16.msrb.mxu1 %v1343_v54  ;;  %v1342_v35 = vpack.c.bf16 %v1337_v56, %v1336_v39 }
 0x6db   : > { %1891 = vmatmul.msk.bf16.vlgmr.msra.gmra.mxu0 %vm827_vm4, %v1166_v38 }
 0x6de   : > { %1355 = vmatpush.bf16.msrb.mxu1 %v1342_v35 }
 0x758   : > { %v1192_v59 = vpop.f32.mrf.mxu0 }
 0x759   : > { %v1193_v60 = vadd.f32 %v1192_v59, %v1167_v2 }
 0x75b   : > { %v1199_v61 = vmul.f32 0.044715, %v1193_v60  ;;  %v1197_v16 = vmul.f32 0.5, %v1193_v60 }
 0x75d   : > { %v1201_v62 = vmul.f32 %v1199_v61, %v1193_v60 }
 0x75f   : > { %v1203_v63 = vmul.f32 %v1201_v62, %v1193_v60 }
 0x760   : > { %v1194_v4 = vpop.f32.mrf.mxu0 }
 0x761   : > { %v1205_v31 = vadd.f32 %v1203_v63, %v1193_v60  ;;  %v1195_v10 = vadd.f32 %v1194_v4, %v1167_v2  ;;  %v1340_v60 = vld [vmem:[%s441_s15 + $0x20] sm:$0x7] }
 0x762   : > { %v1344_v61 = vperm.slane %v1340_v60, 0  ;;  %v1409_v33 = vperm.slane %v1340_v60, 2 }
 0x763   : > { %v1200_v14 = vmul.f32 0.044715, %v1195_v10  ;;  %v1207_v11 = vmul.f32 0.7978846, %v1205_v31  ;;  %v1198_v21 = vmul.f32 0.5, %v1195_v10 }
 0x765   : > { %v1202_v0 = vmul.f32 %v1200_v14, %v1195_v10  ;;  %1980 = vtanh.f32 %v1207_v11 }
 0x767   : > { %v1204_v15 = vmul.f32 %v1202_v0, %v1195_v10 }
 0x769   : > { %v1206_v8 = vadd.f32 %v1204_v15, %v1195_v10 }
 0x76b   : > { %v1208_v18 = vmul.f32 0.7978846, %v1206_v8  ;;  %v1981_v29 = vpop.eup %1980 }
 0x76c   : > { %v1211_v36 = vadd.f32 1.0, %v1981_v29 }
 0x76d   : > { %1982 = vtanh.f32 %v1208_v18 }
 0x76e   : > { %v1213_v3 = vmul.f32 %v1211_v36, %v1197_v16 }
 0x773   : > { %v1983_v19 = vpop.eup %1982 }
 0x774   : > { %v1212_v22 = vadd.f32 1.0, %v1983_v19 }
 0x776   : > { %v1214_v1 = vmul.f32 %v1212_v22, %v1198_v21 }
 0x778   : > { %v1220_v7 = vpack.c.bf16 %v1214_v1, %v1213_v3 }
 0x77a   : > { %1904 = vmatmul.msk.bf16.vlgmr.msra.gmra.mxu1 %vm827_vm4, %v1220_v7 }
 0x7f7   : > { %v1246_v23 = vpop.f32.mrf.mxu1 }
 0x7f8   : > { %v1247_v25 = vadd.f32 %v1246_v23, %v1221_v13 }
 0x7fa   : > { %v1251_v32 = vadd.f32 %v1247_v25, %v2396_v12  ;;  %v1258_v12 = vpop.permute.xlu2 %1257 }
 0x7fb   : > { %v1261_v40 = vrot.slane %v1258_v12, 7 }
 0x7ff   : > { %v1248_v26 = vpop.f32.mrf.mxu1 }
 0x800   : > { %v1249_v28 = vadd.f32 %v1248_v26, %v1221_v13 }
 0x802   : > { %v1252_v34 = vadd.f32 %v1249_v28, %v2401_v17  ;;  %v1282_v17 = vld [vmem:[%s2554_s1] sm:$0xff]  }
 0x803   : > { %v1284_v42 = vunpack.c.l.bf16 %v1282_v17  ;;  %v1285_v9 = vunpack.c.h.bf16 %v1282_v17 }
 0x804   : > { %v1254_v37 = vpack.c.bf16 %v1252_v34, %v1251_v32 }
 0x806   : > { %v1267_v30 = vsel %vm827_vm4, %v1254_v37, 0 }
 0x807   : > { %1276 = vmatpush.bf16.xpose.msra.mxu2 %v1267_v30  ;;  %v1406_v30 = vperm.slane %v1340_v60, 1 }
 0x80e   : > { %1905 = vmatmul.msk.bf16.vlgmr.msra.gmra.mxu2 %vm827_vm4, %v1260_v27 }
 0x891   : > { %v1278_v41 = vpop.f32.mrf.mxu2 }
 0x892   : > { %v1279_v6 = vadd.f32 %v1278_v41, %v1261_v40 }
 0x894   : > { %v1286_v43 = vperm.slane %v1279_v6, 0 }
 0x896   : > { %v1287_v55 = vmul.f32 %v1286_v43, %v1284_v42  ;;  %v1288_v46 = vmul.f32 %v1286_v43, %v1285_v9 }
 0x898   : > { %v1289_v47 = vpack.c.bf16 %v1288_v46, %v1287_v55 }
 0x899   : > { %v1280_v48 = vpop.f32.mrf.mxu2 }
 0x89a   : > { %1910 = vmatmul.msk.bf16.vlgmr.msra.gmra.mxu3 %vm1029_vm14, %v1289_v47 }
 0x91d   : > { %v1310_v49 = vpop.f32.mrf.mxu3 }
 0x925   : > { %v1312_v50 = vpop.f32.mrf.mxu3 }
 0x926   : > { %v2435_v51 = vpack.c.bf16 %v1312_v50, %v1310_v49 }
 0x928   : > { %1911 = vmatmul.msk.bf16.vlgmr.msrb.gmra.mxu0 %vm1029_vm14, %v2435_v51 }
 0x9a5   : > { %v1329_v38 = vpop.f32.mrf.mxu0 }
 0x9a6   : > { %v1334_v2 = vadd.f32 %v1329_v38, %v2380_v44 }
 0x9ad   : > { %v1331_v57 = vpop.f32.mrf.mxu0 }
 0x9ae   : > { %v1335_v58 = vadd.f32 %v1331_v57, %v2382_v45 }
 0x9b0   : > { %v1341_v59 = vpack.c.bf16 %v1335_v58, %v1334_v2 }
 0x9b2   : > { %1912 = vmatmul.msk.bf16.vlgmr.msrb.gmra.mxu1 %vm827_vm4, %v1341_v59 }
 0xa2f   : > { %v1357_v62 = vpop.f32.mrf.mxu1 }
 0xa30   : > { %v1358_v63 = vadd.f32 %v1357_v62, %v1344_v61 }
 0xa32   : > { %v1362_v4 = vsel %vm827_vm4, %v1358_v63, 0.0 }
 0xa33   : > { %1363 = vadd.xlane.f32.xlu1 %v1362_v4 }
 0xa37   : > { %v1359_v31 = vpop.f32.mrf.mxu1 }
 0xa38   : > { %v1360_v10 = vadd.f32 %v1359_v31, %v1344_v61 }
 0xa3a   : > { %v1365_v14 = vsel %vm827_vm4, %v1360_v10, 0.0 }
 0xa3b   : > { %1366 = vadd.xlane.f32.xlu1 %v1365_v14 }
 0xaa6   : > { %v1364_v11 = vpop.xlane.xlu1 %1363 }
 0xaa7   : > { %v1368_v44 = vmul.f32 %v1364_v11, %v2335_v24 }
 0xaa9   : > { %v1370_v0 = vsub.f32 %v1358_v63, %v1368_v44 }
 0xaab   : > { %v1372_v45 = vmul.f32 %v1370_v0, %v1370_v0 }
 0xaad   : > { %v1374_v15 = vsel %vm827_vm4, %v1372_v45, 0.0 }
 0xaae   : > { %1375 = vadd.xlane.f32.xlu0 %v1374_v15  ;;  %v1367_v8 = vpop.xlane.xlu1 %1366 }
 0xaaf   : > { %v1369_v18 = vmul.f32 %v1367_v8, %v2335_v24 }
 0xab1   : > { %v1371_v29 = vsub.f32 %v1360_v10, %v1369_v18 }
 0xab3   : > { %v1373_v36 = vmul.f32 %v1371_v29, %v1371_v29 }
 0xab5   : > { %v1377_v19 = vsel %vm827_vm4, %v1373_v36, 0.0 }
 0xab6   : > { %1378 = vadd.xlane.f32.xlu1 %v1377_v19 }
 0xb21   : > { %v1376_v16 = vpop.xlane.xlu0 %1375 }
 0xb22   : > { %v1380_v21 = vmul.f32 %v1376_v16, %v2335_v24 }
 0xb24   : > { %v1382_v22 = vadd.f32 1e-05, %v1380_v21 }
 0xb26   : > { %1984 = vrsqrt.f32 %v1382_v22  ;;  %vm1390_vm7 = vweird.f32 %v1382_v22 }
 0xb29   : > { %v1379_v3 = vpop.xlane.xlu1 %1378 }
 0xb2a   : > { %v1381_v1 = vmul.f32 %v1379_v3, %v2335_v24 }
 0xb2c   : > { %v1985_v7 = vpop.eup %1984  ;;  %v1383_v23 = vadd.f32 1e-05, %v1381_v1 }
 0xb2d   : > { %v1385_v13 = vmul.f32 %v1985_v7, %v1382_v22  ;;  %vm1391_vm6 = vweird.f32 %v1985_v7 }
 0xb2e   : > { %1986 = vrsqrt.f32 %v1383_v23  ;;  %vm1392_vm8 = vmor %vm1390_vm7, %vm1391_vm6  ;;  %vm1400_vm10 = vweird.f32 %v1383_v23 }
 0xb2f   : > { %v1386_v25 = vmul.f32 %v1985_v7, %v1385_v13 }
 0xb31   : > { %v1387_v26 = vmul.f32 0.5, %v1386_v25 }
 0xb33   : > { %v1388_v28 = vsub.f32 1.5, %v1387_v26 }
 0xb34   : > { %v1987_v32 = vpop.eup %1986 }
 0xb35   : > { %v1389_v34 = vmul.f32 %v1985_v7, %v1388_v28  ;;  %v1395_v37 = vmul.f32 %v1987_v32, %v1383_v23  ;;  %vm1401_vm9 = vweird.f32 %v1987_v32 }
 0xb36   : > { %vm1402_vm11 = vmor %vm1400_vm10, %vm1401_vm9 }
 0xb37   : > { %v1393_v20 = vsel %vm1392_vm8, %v1985_v7, %v1389_v34  ;;  %v1396_v27 = vmul.f32 %v1987_v32, %v1395_v37 }
 0xb38   : > { %v1404_v5 = vmul.f32 %v1393_v20, %v1370_v0 }
 0xb39   : > { %v1397_v12 = vmul.f32 0.5, %v1396_v27 }
 0xb3a   : > { %v1407_v40 = vmul.f32 %v1406_v30, %v1404_v5 }
 0xb3b   : > { %v1398_v17 = vsub.f32 1.5, %v1397_v12 }
 0xb3c   : > { %v1410_v41 = vadd.f32 %v1409_v33, %v1407_v40 }
 0xb3d   : > { %v1399_v6 = vmul.f32 %v1987_v32, %v1398_v17 }
 0xb3e   : > { %v1414_v42 = vmul.f32 0.044715, %v1410_v41  ;;  %v1412_v2 = vmul.f32 0.5, %v1410_v41 }
 0xb3f   : > { %v1403_v9 = vsel %vm1402_vm11, %v1987_v32, %v1399_v6 }
 0xb40   : > { %v1405_v43 = vmul.f32 %v1403_v9, %v1371_v29  ;;  %v1416_v55 = vmul.f32 %v1414_v42, %v1410_v41 }
 0xb42   : > { %v1408_v46 = vmul.f32 %v1406_v30, %v1405_v43  ;;  %v1418_v47 = vmul.f32 %v1416_v55, %v1410_v41 }
 0xb44   : > { %v1411_v48 = vadd.f32 %v1409_v33, %v1408_v46  ;;  %v1420_v49 = vadd.f32 %v1418_v47, %v1410_v41 }
 0xb46   : > { %v1415_v50 = vmul.f32 0.044715, %v1411_v48  ;;  %v1422_v53 = vmul.f32 0.7978846, %v1420_v49  ;;  %v1413_v58 = vmul.f32 0.5, %v1411_v48 }
 0xb48   : > { %v1417_v52 = vmul.f32 %v1415_v50, %v1411_v48  ;;  %1988 = vtanh.f32 %v1422_v53 }
 0xb4a   : > { %v1419_v54 = vmul.f32 %v1417_v52, %v1411_v48 }
 0xb4c   : > { %v1421_v39 = vadd.f32 %v1419_v54, %v1411_v48 }
 0xb4e   : > { %v1423_v56 = vmul.f32 0.7978846, %v1421_v39  ;;  %v1989_v35 = vpop.eup %1988 }
 0xb4f   : > { %v1426_v38 = vadd.f32 1.0, %v1989_v35 }
 0xb50   : > { %1990 = vtanh.f32 %v1423_v56 }
 0xb51   : > { %v1428_v60 = vmul.f32 %v1426_v38, %v1412_v2 }
 0xb56   : > { %v1991_v57 = vpop.eup %1990 }
 0xb57   : > { %v1427_v59 = vadd.f32 1.0, %v1991_v57 }
 0xb59   : > { %v1429_v61 = vmul.f32 %v1427_v59, %v1413_v58 }
 0xb5b   : > { %v1430_v62 = vpack.c.bf16 %v1429_v61, %v1428_v60 }
 0xb5d   : > { %1438 = vmatpush.bf16.msrb.mxu2 %v1430_v62 }
 0xb60   : > { %1913 = vmatmul.msk.bf16.vlgmr.msrb.gmra.mxu2 %vm1029_vm14, %v2435_v51 }
 0xbe3   : > { %v1440_v63 = vpop.f32.mrf.mxu2 }
 0xbe4   : > { %v2456_v4 = vadd.f32 %v1440_v63, %v1428_v60 }
 0xbe8   : > { %1450 = sbr.rel (%p1914_p4) target bundleno = 3627 (0xe2b), region = 68 }
 0xbeb   : > { %v1442_v31 = vpop.f32.mrf.mxu2 }
 0xbec   : > { %v2458_v10 = vadd.f32 %v1442_v31, %v1429_v61 }
 0xbed   : > { %v1453_v14 = vld [vmem:[%s2560_s7 + $0x10] sm:$0xff]  ;;  %v1454_v11 = vld [vmem:[%s2560_s7 + $0x18] sm:$0xff]  ;;  %v1451_v51 = vld [vmem:[%s2560_s7] sm:$0xff]  ;;  %v2029_v3 = vmov 16.0   ;;  %vm1575_vm5 = vcmask 7168  }
 0xbee   : > { %v1458_v44 = vpack.c.bf16 %v1454_v11, %v1453_v14  ;;  %v1452_v0 = vld [vmem:[%s2560_s7 + $0x8] sm:$0xff]  ;;  %v1456_v15 = vpack.c.bf16 %v2458_v10, %v2456_v4  ;;  %v2479_v8 = vld [vmem:[%s2560_s7 + $0x20] sm:$0x7]  ;;  %1994 = vrcp.f32 %v2029_v3 }
 0xbef   : > { %v1457_v45 = vpack.c.bf16 %v1452_v0, %v1451_v51  ;;  %v1459_v18 = vperm.slane %v2479_v8, 0  ;;  %v1552_v6 = vld [vmem:[%s2561_s8] sm:$0xff]  ;;  %v1553_v42 = vld [vmem:[%s2561_s8 + $0x8] sm:$0xff]  ;;  %v1528_v56 = vperm.slane %v2479_v8, 1  ;;  %v1531_v57 = vperm.slane %v2479_v8, 2 }
 0xbf0   : > { %1469 = vmatpush.bf16.msra.mxu0 %v1458_v44  ;;  %v1556_v9 = vpack.c.bf16 %v1553_v42, %v1552_v6 }
 0xbf2   : > { %1568 = vmatpush.bf16.msra.mxu1 %v1556_v9 }
 0xbf4   : > { %1470 = vmatpush.bf16.msra.mxu0 %v1457_v45  ;;  %v1995_v1 = vpop.eup %1994 }
 0xbf5   : > { %v1484_v7 = vmul.f32 16.0, %v1995_v1  ;;  %vm1488_vm12 = vweird.f32 %v1995_v1 }
 0xbf7   : > { %1915 = vmatmul.msk.bf16.vlgmr.msra.gmra.mxu0 %vm827_vm4, %v1456_v15  ;;  %v1485_v23 = vsub.f32 1.0, %v1484_v7 }
 0xbf9   : > { %v1486_v13 = vmul.f32 %v1995_v1, %v1485_v23 }
 0xbfb   : > { %v1487_v25 = vadd.f32 %v1995_v1, %v1486_v13 }
 0xbfd   : > { %v1489_v26 = vsel %vm1488_vm12, %v1995_v1, %v1487_v25 }
 0xc74   : > { %v1472_v29 = vpop.f32.mrf.mxu0 }
 0xc75   : > { %v1473_v36 = vadd.f32 %v1472_v29, %v1459_v18 }
 0xc77   : > { %v1477_v19 = vsel %vm1029_vm14, %v1473_v36, 0.0 }
 0xc78   : > { %1478 = vadd.xlane.f32.xlu0 %v1477_v19 }
 0xc7c   : > { %v1474_v16 = vpop.f32.mrf.mxu0 }
 0xc7d   : > { %v1475_v21 = vadd.f32 %v1474_v16, %v1459_v18 }
 0xc7f   : > { %v1480_v22 = vsel %vm1029_vm14, %v1475_v21, 0.0 }
 0xc80   : > { %1481 = vadd.xlane.f32.xlu0 %v1480_v22 }
 0xceb   : > { %v1479_v28 = vpop.xlane.xlu0 %1478 }
 0xcec   : > { %v1490_v32 = vmul.f32 %v1489_v26, %v1479_v28 }
 0xcee   : > { %v1492_v34 = vsub.f32 %v1473_v36, %v1490_v32 }
 0xcf0   : > { %v1494_v37 = vmul.f32 %v1492_v34, %v1492_v34 }
 0xcf2   : > { %v1496_v30 = vsel %vm1029_vm14, %v1494_v37, 0.0 }
 0xcf3   : > { %1497 = vadd.xlane.f32.xlu1 %v1496_v30  ;;  %v1482_v20 = vpop.xlane.xlu0 %1481 }
 0xcf4   : > { %v1491_v27 = vmul.f32 %v1489_v26, %v1482_v20 }
 0xcf6   : > { %v1493_v33 = vsub.f32 %v1475_v21, %v1491_v27 }
 0xcf8   : > { %v1495_v5 = vmul.f32 %v1493_v33, %v1493_v33 }
 0xcfa   : > { %v1499_v12 = vsel %vm1029_vm14, %v1495_v5, 0.0 }
 0xcfb   : > { %1500 = vadd.xlane.f32.xlu1 %v1499_v12 }
 0xd66   : > { %v1498_v40 = vpop.xlane.xlu1 %1497 }
 0xd67   : > { %v1502_v17 = vmul.f32 %v1498_v40, %v1489_v26 }
 0xd69   : > { %v1504_v41 = vadd.f32 1e-05, %v1502_v17 }
 0xd6b   : > { %1996 = vrsqrt.f32 %v1504_v41  ;;  %vm1512_vm15 = vweird.f32 %v1504_v41 }
 0xd6e   : > { %v1501_v43 = vpop.xlane.xlu1 %1500 }
 0xd6f   : > { %v1503_v55 = vmul.f32 %v1501_v43, %v1489_v26  ;;  %v1993_v26 = vld [vmem:[%s2561_s8 + $0x10] ss:$0 sm:$0xff] }
 0xd71   : > { %v1997_v46 = vpop.eup %1996  ;;  %v1505_v47 = vadd.f32 1e-05, %v1503_v55 }
 0xd72   : > { %v1507_v48 = vmul.f32 %v1997_v46, %v1504_v41  ;;  %vm1513_vm13 = vweird.f32 %v1997_v46 }
 0xd73   : > { %1998 = vrsqrt.f32 %v1505_v47  ;;  %vm1514_vm0 = vmor %vm1512_vm15, %vm1513_vm13  ;;  %vm1522_vm2 = vweird.f32 %v1505_v47 }
 0xd74   : > { %v1508_v49 = vmul.f32 %v1997_v46, %v1507_v48 }
 0xd76   : > { %v1509_v50 = vmul.f32 0.5, %v1508_v49 }
 0xd78   : > { %v1510_v52 = vsub.f32 1.5, %v1509_v50 }
 0xd79   : > { %v1999_v53 = vpop.eup %1998 }
 0xd7a   : > { %v1511_v54 = vmul.f32 %v1997_v46, %v1510_v52  ;;  %v1517_v39 = vmul.f32 %v1999_v53, %v1505_v47  ;;  %vm1523_vm1 = vweird.f32 %v1999_v53 }
 0xd7b   : > { %vm1524_vm3 = vmor %vm1522_vm2, %vm1523_vm1 }
 0xd7c   : > { %v1515_v35 = vsel %vm1514_vm0, %v1997_v46, %v1511_v54  ;;  %v1518_v38 = vmul.f32 %v1999_v53, %v1517_v39 }
 0xd7d   : > { %v1526_v2 = vmul.f32 %v1515_v35, %v1492_v34 }
 0xd7e   : > { %v1519_v58 = vmul.f32 0.5, %v1518_v38 }
 0xd7f   : > { %v1529_v59 = vmul.f32 %v1528_v56, %v1526_v2 }
 0xd80   : > { %v1520_v60 = vsub.f32 1.5, %v1519_v58 }
 0xd81   : > { %v1532_v61 = vadd.f32 %v1531_v57, %v1529_v59 }
 0xd82   : > { %v1521_v62 = vmul.f32 %v1999_v53, %v1520_v60 }
 0xd83   : > { %v1536_v63 = vmul.f32 0.044715, %v1532_v61  ;;  %v1534_v3 = vmul.f32 0.5, %v1532_v61 }
 0xd84   : > { %v1525_v31 = vsel %vm1524_vm3, %v1999_v53, %v1521_v62 }
 0xd85   : > { %v1527_v14 = vmul.f32 %v1525_v31, %v1493_v33  ;;  %v1538_v11 = vmul.f32 %v1536_v63, %v1532_v61 }
 0xd87   : > { %v1530_v51 = vmul.f32 %v1528_v56, %v1527_v14  ;;  %v1540_v44 = vmul.f32 %v1538_v11, %v1532_v61 }
 0xd89   : > { %v1533_v0 = vadd.f32 %v1531_v57, %v1530_v51  ;;  %v1542_v45 = vadd.f32 %v1540_v44, %v1532_v61 }
 0xd8b   : > { %v1537_v15 = vmul.f32 0.044715, %v1533_v0  ;;  %v1544_v8 = vmul.f32 0.7978846, %v1542_v45  ;;  %v1535_v1 = vmul.f32 0.5, %v1533_v0 }
 0xd8d   : > { %v1539_v18 = vmul.f32 %v1537_v15, %v1533_v0  ;;  %2000 = vtanh.f32 %v1544_v8 }
 0xd8f   : > { %v1541_v29 = vmul.f32 %v1539_v18, %v1533_v0 }
 0xd91   : > { %v1543_v36 = vadd.f32 %v1541_v29, %v1533_v0 }
 0xd93   : > { %v1545_v19 = vmul.f32 0.7978846, %v1543_v36  ;;  %v2001_v16 = vpop.eup %2000 }
 0xd94   : > { %v1548_v21 = vadd.f32 1.0, %v2001_v16 }
 0xd95   : > { %2002 = vtanh.f32 %v1545_v19 }
 0xd96   : > { %v1550_v23 = vmul.f32 %v1548_v21, %v1534_v3 }
 0xd9b   : > { %v2003_v22 = vpop.eup %2002 }
 0xd9c   : > { %v1549_v7 = vadd.f32 1.0, %v2003_v22 }
 0xd9e   : > { %v1551_v13 = vmul.f32 %v1549_v7, %v1535_v1 }
 0xda0   : > { %v1555_v25 = vpack.c.bf16 %v1551_v13, %v1550_v23 }
 0xda2   : > { %1916 = vmatmul.msk.bf16.vlgmr.msra.gmra.mxu1 %vm1029_vm14, %v1555_v25 }
 0xe1f   : > { %v1570_v28 = vpop.f32.mrf.mxu1 }
 0xe20   : > { %v1571_v32 = vadd.f32 %v1993_v26, %v1570_v28 }
 0xe22   : > { %1576 = vst.msk [vmem:[%s2116_s25] sm:$0xff] %vm1575_vm5, %v1571_v32 }
 0xe27   : > { %v1572_v34 = vpop.f32.mrf.mxu1 }
 0xe28   : > { %v1573_v37 = vadd.f32 %v1993_v26, %v1572_v34 }
 0xe2a   : > { %1577 = vst.msk [vmem:[%s2116_s25 + $0x8] sm:$0xff] %vm1575_vm5, %v1573_v37 }
 0xe2b PF: > { %p1917_p5 = scmp.ne.s32.totalorder %s2096_s18, 1 }
 0xe2d   : > { %1581 = sbr.rel (%p1917_p5) target bundleno = 4208 (0x1070), region = 72 }
 0xe32   : > { %v1584_v30 = vld [vmem:[%s2562_s9 + $0x10] sm:$0xff]  ;;  %v1585_v20 = vld [vmem:[%s2562_s9 + $0x18] sm:$0xff]  ;;  %v1582_v27 = vld [vmem:[%s2562_s9] sm:$0xff]  ;;  %v1587_v40 = vpack.c.bf16 %v2458_v10, %v2456_v4  ;;  %vm1702_vm11 = vcmask 7168  }
 0xe33   : > { %v1589_v33 = vpack.c.bf16 %v1585_v20, %v1584_v30  ;;  %v1583_v5 = vld [vmem:[%s2562_s9 + $0x8] sm:$0xff]  ;;  %v2519_v17 = vld [vmem:[%s2562_s9 + $0x20] sm:$0x7]  ;;  %v1678_v57 = vld [vmem:[%s2563_s10 + $0x10] sm:$0xff] }
 0xe34   : > { %v1588_v12 = vpack.c.bf16 %v1583_v5, %v1582_v27  ;;  %v1590_v41 = vperm.slane %v2519_v17, 0  ;;  %v1679_v2 = vld [vmem:[%s2563_s10 + $0x18] sm:$0xff]  ;;  %v1676_v58 = vld [vmem:[%s2563_s10] sm:$0xff]  ;;  %v1677_v60 = vld [vmem:[%s2563_s10 + $0x8] sm:$0xff]  ;;  %v1652_v8 = vperm.slane %v2519_v17, 1 }
 0xe35   : > { %1600 = vmatpush.bf16.msra.mxu0 %v1589_v33  ;;  %v1683_v59 = vpack.c.bf16 %v1679_v2, %v1678_v57  ;;  %v1682_v61 = vpack.c.bf16 %v1677_v60, %v1676_v58 }
 0xe37   : > { %1694 = vmatpush.bf16.msra.mxu1 %v1683_v59 }
 0xe39   : > { %1601 = vmatpush.bf16.msra.mxu0 %v1588_v12 }
 0xe3b   : > { %1695 = vmatpush.bf16.msra.mxu1 %v1682_v61 }
 0xe3c   : > { %1918 = vmatmul.msk.bf16.vlgmr.msra.gmra.mxu0 %vm827_vm4, %v1587_v40 }
 0xeb9   : > { %v1603_v6 = vpop.f32.mrf.mxu0 }
 0xeba   : > { %v1604_v42 = vadd.f32 %v1603_v6, %v1590_v41 }
 0xebc   : > { %v1608_v9 = vsel %vm827_vm4, %v1604_v42, 0.0 }
 0xebd   : > { %1609 = vadd.xlane.f32.xlu0 %v1608_v9 }
 0xec1   : > { %v1605_v43 = vpop.f32.mrf.mxu0 }
 0xec2   : > { %v1606_v55 = vadd.f32 %v1605_v43, %v1590_v41 }
 0xec4   : > { %v1611_v46 = vsel %vm827_vm4, %v1606_v55, 0.0 }
 0xec5   : > { %1612 = vadd.xlane.f32.xlu0 %v1611_v46  ;;  %v2004_v46 = vld [vmem:[%s2563_s10 + $0x20] ss:$0 sm:$0xff] }
 0xf30   : > { %v1610_v4 = vpop.xlane.xlu0 %1609 }
 0xf31   : > { %v1614_v10 = vmul.f32 %v1610_v4, %v2335_v24 }
 0xf33   : > { %v1616_v47 = vsub.f32 %v1604_v42, %v1614_v10 }
 0xf35   : > { %v1618_v48 = vmul.f32 %v1616_v47, %v1616_v47 }
 0xf37   : > { %v1620_v49 = vsel %vm827_vm4, %v1618_v48, 0.0 }
 0xf38   : > { %1621 = vadd.xlane.f32.xlu1 %v1620_v49  ;;  %v1613_v50 = vpop.xlane.xlu0 %1612 }
 0xf39   : > { %v1615_v52 = vmul.f32 %v1613_v50, %v2335_v24 }
 0xf3b   : > { %v1617_v53 = vsub.f32 %v1606_v55, %v1615_v52 }
 0xf3d   : > { %v1619_v54 = vmul.f32 %v1617_v53, %v1617_v53 }
 0xf3f   : > { %v1623_v39 = vsel %vm827_vm4, %v1619_v54, 0.0 }
 0xf40   : > { %1624 = vadd.xlane.f32.xlu1 %v1623_v39 }
 0xfab   : > { %v1622_v56 = vpop.xlane.xlu1 %1621 }
 0xfac   : > { %v1626_v35 = vmul.f32 %v1622_v56, %v2335_v24 }
 0xfae   : > { %v1628_v38 = vadd.f32 1e-05, %v1626_v35 }
 0xfb0   : > { %2005 = vrsqrt.f32 %v1628_v38  ;;  %vm1636_vm6 = vweird.f32 %v1628_v38 }
 0xfb3   : > { %v1625_v62 = vpop.xlane.xlu1 %1624 }
 0xfb4   : > { %v1627_v63 = vmul.f32 %v1625_v62, %v2335_v24  ;;  %v1655_v24 = vperm.slane %v2519_v17, 2 }
 0xfb6   : > { %v2006_v31 = vpop.eup %2005  ;;  %v1629_v14 = vadd.f32 1e-05, %v1627_v63 }
 0xfb7   : > { %v1631_v11 = vmul.f32 %v2006_v31, %v1628_v38  ;;  %vm1637_vm14 = vweird.f32 %v2006_v31 }
 0xfb8   : > { %2007 = vrsqrt.f32 %v1629_v14  ;;  %vm1638_vm7 = vmor %vm1636_vm6, %vm1637_vm14  ;;  %vm1646_vm9 = vweird.f32 %v1629_v14 }
 0xfb9   : > { %v1632_v51 = vmul.f32 %v2006_v31, %v1631_v11 }
 0xfbb   : > { %v1633_v44 = vmul.f32 0.5, %v1632_v51 }
 0xfbd   : > { %v1634_v0 = vsub.f32 1.5, %v1633_v44 }
 0xfbe   : > { %v2008_v45 = vpop.eup %2007 }
 0xfbf   : > { %v1635_v15 = vmul.f32 %v2006_v31, %v1634_v0  ;;  %v1641_v18 = vmul.f32 %v2008_v45, %v1629_v14  ;;  %vm1647_vm8 = vweird.f32 %v2008_v45 }
 0xfc0   : > { %vm1648_vm10 = vmor %vm1646_vm9, %vm1647_vm8 }
 0xfc1   : > { %v1639_v29 = vsel %vm1638_vm7, %v2006_v31, %v1635_v15  ;;  %v1642_v36 = vmul.f32 %v2008_v45, %v1641_v18 }
 0xfc2   : > { %v1650_v19 = vmul.f32 %v1639_v29, %v1616_v47 }
 0xfc3   : > { %v1643_v16 = vmul.f32 0.5, %v1642_v36 }
 0xfc4   : > { %v1653_v21 = vmul.f32 %v1652_v8, %v1650_v19 }
 0xfc5   : > { %v1644_v22 = vsub.f32 1.5, %v1643_v16 }
 0xfc6   : > { %v1656_v3 = vadd.f32 %v1655_v24, %v1653_v21 }
 0xfc7   : > { %v1645_v1 = vmul.f32 %v2008_v45, %v1644_v22 }
 0xfc8   : > { %v1660_v7 = vmul.f32 0.044715, %v1656_v3  ;;  %v1658_v41 = vmul.f32 0.5, %v1656_v3 }
 0xfc9   : > { %v1649_v23 = vsel %vm1648_vm10, %v2008_v45, %v1645_v1 }
 0xfca   : > { %v1651_v13 = vmul.f32 %v1649_v23, %v1617_v53  ;;  %v1662_v25 = vmul.f32 %v1660_v7, %v1656_v3 }
 0xfcc   : > { %v1654_v26 = vmul.f32 %v1652_v8, %v1651_v13  ;;  %v1664_v28 = vmul.f32 %v1662_v25, %v1656_v3 }
 0xfce   : > { %v1657_v32 = vadd.f32 %v1655_v24, %v1654_v26  ;;  %v1666_v34 = vadd.f32 %v1664_v28, %v1656_v3 }
 0xfd0   : > { %v1661_v37 = vmul.f32 0.044715, %v1657_v32  ;;  %v1668_v20 = vmul.f32 0.7978846, %v1666_v34  ;;  %v1659_v6 = vmul.f32 0.5, %v1657_v32 }
 0xfd2   : > { %v1663_v30 = vmul.f32 %v1661_v37, %v1657_v32  ;;  %2009 = vtanh.f32 %v1668_v20 }
 0xfd4   : > { %v1665_v27 = vmul.f32 %v1663_v30, %v1657_v32 }
 0xfd6   : > { %v1667_v33 = vadd.f32 %v1665_v27, %v1657_v32 }
 0xfd8   : > { %v1669_v5 = vmul.f32 0.7978846, %v1667_v33  ;;  %v2010_v12 = vpop.eup %2009 }
 0xfd9   : > { %v1672_v40 = vadd.f32 1.0, %v2010_v12 }
 0xfda   : > { %2011 = vtanh.f32 %v1669_v5 }
 0xfdb   : > { %v1674_v9 = vmul.f32 %v1672_v40, %v1658_v41 }
 0xfe0   : > { %v2012_v17 = vpop.eup %2011 }
 0xfe1   : > { %v1673_v42 = vadd.f32 1.0, %v2012_v17 }
 0xfe3   : > { %v1675_v43 = vmul.f32 %v1673_v42, %v1659_v6 }
 0xfe5   : > { %v1681_v55 = vpack.c.bf16 %v1675_v43, %v1674_v9 }
 0xfe7   : > { %1919 = vmatmul.msk.bf16.vlgmr.msra.gmra.mxu1 %vm827_vm4, %v1681_v55 }
0x1064   : > { %v1697_v4 = vpop.f32.mrf.mxu1 }
0x1065   : > { %v1698_v10 = vadd.f32 %v2004_v46, %v1697_v4 }
0x1067   : > { %1703 = vst.msk [vmem:[%s2116_s25] sm:$0xff] %vm1702_vm11, %v1698_v10 }
0x106c   : > { %v1699_v47 = vpop.f32.mrf.mxu1 }
0x106d   : > { %v1700_v48 = vadd.f32 %v2004_v46, %v1699_v47 }
0x106f   : > { %1704 = vst.msk [vmem:[%s2116_s25 + $0x8] sm:$0xff] %vm1702_vm11, %v1700_v48 }
0x1070 PF: > { %s21_s17 = sadd.s32 1, %s2019_s17  }
0x1071   : > { %p18_p6 = scmp.ge.s32.totalorder %s21_s17, 4  }
0x1073   :  { %20 = sbr.rel (!%p18_p6) target bundleno = 1 (0x1), region = 117 }

</bundles_post_ra>
